<compile_context>
chip_gen: v7x
topology: tpu7x:2x2x1
jax: 0.10.0
libtpu: 0.0.40
codegen_flags: <defaults>
</compile_context>

<pallas_src>
import functools

import jax
import jax.numpy as jnp
from jax.experimental import pallas as pl
from jax.experimental.pallas import tpu as pltpu


# ---------------------------------------------------------------------------
# In-kernel helpers
# ---------------------------------------------------------------------------
def _layernorm(x, gamma, beta, eps=1e-5):
    mu = jnp.mean(x, axis=-1, keepdims=True)
    var = jnp.mean(jnp.square(x - mu), axis=-1, keepdims=True)
    return (x - mu) * jax.lax.rsqrt(var + eps) * gamma + beta


# ---------------------------------------------------------------------------
# Fused encoder kernel: grid = (batch_tiles, layers)
# ---------------------------------------------------------------------------
def _encoder_kernel(num_heads,
                    x_ref, kbias_ref, eot_ref,
                    wqkv_ref, bqkv_ref, wo_ref, bo_ref,
                    ln1_g_ref, ln1_b_ref,
                    w1_ref, b1_ref, w2_ref, b2_ref,
                    ln2_g_ref, ln2_b_ref,
                    aln_g_ref, aln_b_ref, aw_ref, ab_ref,
                    out_ref,
                    x_sc):
    layer = pl.program_id(1)
    n_layers = pl.num_programs(1)

    # Load the embedded tokens into the resident activation scratch once.
    @pl.when(layer == 0)
    def _():
        x_sc[...] = x_ref[...]

    x = x_sc[...]                                     # (Bt, S, D) f32
    _, _, D = x.shape
    hd = D // num_heads
    scale = 1.0 / float(hd) ** 0.5

    # ---- fused QKV projection (bf16 MXU operands, f32 accumulate) ----------
    xb = x.astype(jnp.bfloat16)
    qkv = jnp.einsum('bsd,de->bse', xb, wqkv_ref[...],
                     preferred_element_type=jnp.float32) + bqkv_ref[...]
    kbias = kbias_ref[...]                            # (Bt, 1, S) additive bias

    # ---- per-head attention; heads concatenated, then ONE output proj ------
    heads = []
    for h in range(num_heads):
        qh = qkv[..., h * hd:(h + 1) * hd]
        kh = qkv[..., D + h * hd:D + (h + 1) * hd]
        vh = qkv[..., 2 * D + h * hd:2 * D + (h + 1) * hd]
        s = jnp.einsum('bqd,bkd->bqk',
                       qh.astype(jnp.bfloat16), kh.astype(jnp.bfloat16),
                       preferred_element_type=jnp.float32) * scale
        s = s + kbias                                  # broadcast over queries
        m = jnp.max(s, axis=-1, keepdims=True)
        e = jnp.exp(s - m)
        p = e * pl.reciprocal(jnp.sum(e, axis=-1, keepdims=True), approx=True)
        oh = jnp.einsum('bqk,bkd->bqd',
                        p.astype(jnp.bfloat16), vh.astype(jnp.bfloat16),
                        preferred_element_type=jnp.float32)
        heads.append(oh)
    attn = jnp.concatenate(heads, axis=-1).astype(jnp.bfloat16)    # (Bt,S,D)
    attn = jnp.einsum('bsd,de->bse', attn, wo_ref[...],
                      preferred_element_type=jnp.float32) + bo_ref[...]

    # ---- residual + post-LN, MLP (GELU), residual + post-LN ----------------
    x = _layernorm(x + attn, ln1_g_ref[...], ln1_b_ref[...])

    h1 = jnp.einsum('bsd,de->bse', x.astype(jnp.bfloat16), w1_ref[...],
                    preferred_element_type=jnp.float32) + b1_ref[...]
    # TODO(synk): PyTorch default GELU is exact-erf; tanh approx differs ~1e-3.
    h1 = jax.nn.gelu(h1, approximate=True)
    h2 = jnp.einsum('bse,ed->bsd', h1.astype(jnp.bfloat16), w2_ref[...],
                    preferred_element_type=jnp.float32) + b2_ref[...]
    x = _layernorm(x + h2, ln2_g_ref[...], ln2_b_ref[...])

    x_sc[...] = x

    # ---- last layer: EOT pooling + align LayerNorm + Linear (fused) --------
    @pl.when(layer == n_layers - 1)
    def _():
        sel = eot_ref[...][:, 0, :]                    # (Bt, S) one-hot
        pooled = jnp.sum(sel[..., None] * x, axis=1, keepdims=True)  # (Bt,1,D)
        pooled = _layernorm(pooled, aln_g_ref[...], aln_b_ref[...])
        out_ref[...] = jnp.einsum('bad,de->bae',
                                  pooled.astype(jnp.bfloat16), aw_ref[...],
                                  preferred_element_type=jnp.float32) + ab_ref[...]


# ---------------------------------------------------------------------------
# Wrapper: embedding gather / mask / EOT one-hot in JAX (glue, no hot matmul),
# single pallas_call for all transformer layers + pooled align projection.
# ---------------------------------------------------------------------------
def text_encoder_forward(input_seq, params, num_heads, batch_tile=1):
    B, S0 = input_seq.shape
    D = params['emb'].shape[1]
    L = params['wqkv'].shape[0]
    M = params['w1'].shape[2]
    A = params['align_w'].shape[1]

    # Pad sequence to a sublane multiple of 8 with PAD tokens (mask hides them).
    S = max(8, -(-S0 // 8) * 8)
    seq = jnp.pad(input_seq, ((0, 0), (0, S - S0))) if S != S0 else input_seq
    pos = params['pos'][:, :S0]
    if S != S0:
        pos = jnp.pad(pos, ((0, 0), (0, S - S0), (0, 0)))

    x = jnp.take(params['emb'], seq, axis=0) + pos                  # (B,S,D)
    key_bias = jnp.where(seq == 0, -1e9, 0.0).astype(jnp.float32)[:, None, :]
    eot = jax.nn.one_hot(jnp.argmax(seq, axis=-1), S,
                         dtype=jnp.float32)[:, None, :]             # (B,1,S)

    if B % batch_tile:
        batch_tile = 1
    Bt = batch_tile
    grid = (B // Bt, L)

    bmap = lambda b, l: (b, 0, 0)     # activation blocks: per batch tile
    lmap = lambda b, l: (l, 0, 0)     # stacked per-layer weights
    cmap = lambda b, l: (0, 0)        # shared (align) params

    in_specs = [
        pl.BlockSpec((Bt, S, D), bmap),          # x (embedded tokens)
        pl.BlockSpec((Bt, 1, S), bmap),          # key padding bias
        pl.BlockSpec((Bt, 1, S), bmap),          # EOT one-hot selector
        pl.BlockSpec((None, D, 3 * D), lmap),    # wqkv   (bf16)
        pl.BlockSpec((None, 1, 3 * D), lmap),    # bqkv
        pl.BlockSpec((None, D, D), lmap),        # wo     (bf16)
        pl.BlockSpec((None, 1, D), lmap),        # bo
        pl.BlockSpec((None, 1, D), lmap),        # ln1_g
        pl.BlockSpec((None, 1, D), lmap),        # ln1_b
        pl.BlockSpec((None, D, M), lmap),        # w1     (bf16)
        pl.BlockSpec((None, 1, M), lmap),        # b1
        pl.BlockSpec((None, M, D), lmap),        # w2     (bf16)
        pl.BlockSpec((None, 1, D), lmap),        # b2
        pl.BlockSpec((None, 1, D), lmap),        # ln2_g
        pl.BlockSpec((None, 1, D), lmap),        # ln2_b
        pl.BlockSpec((1, D), cmap),              # align ln gamma
        pl.BlockSpec((1, D), cmap),              # align ln beta
        pl.BlockSpec((D, A), cmap),              # align weight (bf16)
        pl.BlockSpec((1, A), cmap),              # align bias
    ]
    out_specs = pl.BlockSpec((Bt, 1, A), bmap)

    # Explicit VMEM budget: double-buffered weight/activation blocks + resident
    # scratch + in-kernel temporaries, clamped to [16 MiB, 64 MiB] (v7x phys).
    w_blk = 2 * (3 * D * D + D * D + D * M + M * D) + 4 * (3 * D + 6 * D + M)
    act_blk = 4 * Bt * S * (2 * D + 2) + 4 * Bt * A
    temps = 4 * Bt * S * (5 * D + M + num_heads * S)
    vmem_limit = int(min(64 << 20,
                         max(16 << 20, 2 * (w_blk + act_blk) + temps + (2 << 20))))

    kernel = functools.partial(_encoder_kernel, num_heads)
    out = pl.pallas_call(
        kernel,
        out_shape=jax.ShapeDtypeStruct((B, 1, A), jnp.float32),
        grid_spec=pltpu.PrefetchScalarGridSpec(
            num_scalar_prefetch=0,
            grid=grid,
            in_specs=in_specs,
            out_specs=out_specs,
            scratch_shapes=[pltpu.VMEM((Bt, S, D), jnp.float32)],
        ),
        compiler_params=pltpu.CompilerParams(
            dimension_semantics=("parallel", "arbitrary"),
            vmem_limit_bytes=vmem_limit,
        ),
    )(x, key_bias, eot,
      params['wqkv'], params['bqkv'], params['wo'], params['bo'],
      params['ln1_g'], params['ln1_b'],
      params['w1'], params['b1'], params['w2'], params['b2'],
      params['ln2_g'], params['ln2_b'],
      params['align_ln_g'], params['align_ln_b'],
      params['align_w'], params['align_b'])
    return out[:, 0, :]


# ---------------------------------------------------------------------------
# Deterministic parameter init (synthetic; no checkpoint load).
# Matmul weights stacked per layer and stored in bf16; LN/bias params in f32.
# ---------------------------------------------------------------------------
def init_params(key, vocab_size, text_max_len, embed_dim, align_dim,
                num_layers, num_heads, mlp_dim):
    D, M, L = embed_dim, mlp_dim, num_layers

    def nrm(k, shape, scale=0.02):
        return (scale * jax.random.normal(k, shape)).astype(jnp.float32)

    keys = jax.random.split(key, 3 + L)
    p = {
        'emb': nrm(keys[0], (vocab_size, D)),
        'pos': nrm(keys[1], (1, text_max_len, D)),
    }
    wqkv, wo, w1, w2 = [], [], [], []
    for i in range(L):
        ks = jax.random.split(keys[2 + i], 6)
        wq, wk, wv = nrm(ks[0], (D, D)), nrm(ks[1], (D, D)), nrm(ks[2], (D, D))
        wqkv.append(jnp.concatenate([wq, wk, wv], axis=1))
        wo.append(nrm(ks[3], (D, D)))
        w1.append(nrm(ks[4], (D, M)))
        w2.append(nrm(ks[5], (M, D)))
    p['wqkv'] = jnp.stack(wqkv).astype(jnp.bfloat16)       # (L, D, 3D)
    p['bqkv'] = jnp.zeros((L, 1, 3 * D), jnp.float32)
    p['wo'] = jnp.stack(wo).astype(jnp.bfloat16)           # (L, D, D)
    p['bo'] = jnp.zeros((L, 1, D), jnp.float32)
    p['ln1_g'] = jnp.ones((L, 1, D), jnp.float32)
    p['ln1_b'] = jnp.zeros((L, 1, D), jnp.float32)
    p['w1'] = jnp.stack(w1).astype(jnp.bfloat16)           # (L, D, M)
    p['b1'] = jnp.zeros((L, 1, M), jnp.float32)
    p['w2'] = jnp.stack(w2).astype(jnp.bfloat16)           # (L, M, D)
    p['b2'] = jnp.zeros((L, 1, D), jnp.float32)
    p['ln2_g'] = jnp.ones((L, 1, D), jnp.float32)
    p['ln2_b'] = jnp.zeros((L, 1, D), jnp.float32)
    ka, _ = jax.random.split(keys[-1])
    p['align_ln_g'] = jnp.ones((1, D), jnp.float32)
    p['align_ln_b'] = jnp.zeros((1, D), jnp.float32)
    p['align_w'] = nrm(ka, (D, align_dim)).astype(jnp.bfloat16)
    p['align_b'] = jnp.zeros((1, align_dim), jnp.float32)
    return p


# ---------------------------------------------------------------------------
if __name__ == "__main__":
    vocab_size, text_max_len = 50, 8
    embed_dim, align_dim = 32, 16
    num_layers, num_heads, mlp_dim = 2, 4, 64
    batch = 2

    key = jax.random.PRNGKey(0)
    pkey, dkey = jax.random.split(key)
    params = init_params(pkey, vocab_size, text_max_len, embed_dim, align_dim,
                         num_layers, num_heads, mlp_dim)

    input_seq = jax.random.randint(dkey, (batch, text_max_len), 1, vocab_size,
                                   dtype=jnp.int32)
    # Introduce PAD(=0) tokens so the padding mask actually masks something.
    input_seq = input_seq.at[0, 6:].set(0)
    input_seq = input_seq.at[1, 7:].set(0)

    out = text_encoder_forward(input_seq, params, num_heads, batch_tile=1)
    out = jax.block_until_ready(out)
    assert out.shape == (batch, align_dim), out.shape
    assert bool(jnp.all(jnp.isfinite(out)))
    print("KERNEL_OK")
</pallas_src>

<mosaic_0001>
module attributes {stable_mosaic.version = 11 : i64} {
  func.func @_encoder_kernel(%arg0: i32, %arg1: i32, %arg2: memref<1x8x32xf32, #tpu.memory_space<vmem>>, %arg3: memref<1x1x8xf32, #tpu.memory_space<vmem>>, %arg4: memref<1x1x8xf32, #tpu.memory_space<vmem>>, %arg5: memref<1x32x96xbf16, #tpu.memory_space<vmem>>, %arg6: memref<1x1x96xf32, #tpu.memory_space<vmem>>, %arg7: memref<1x32x32xbf16, #tpu.memory_space<vmem>>, %arg8: memref<1x1x32xf32, #tpu.memory_space<vmem>>, %arg9: memref<1x1x32xf32, #tpu.memory_space<vmem>>, %arg10: memref<1x1x32xf32, #tpu.memory_space<vmem>>, %arg11: memref<1x32x64xbf16, #tpu.memory_space<vmem>>, %arg12: memref<1x1x64xf32, #tpu.memory_space<vmem>>, %arg13: memref<1x64x32xbf16, #tpu.memory_space<vmem>>, %arg14: memref<1x1x32xf32, #tpu.memory_space<vmem>>, %arg15: memref<1x1x32xf32, #tpu.memory_space<vmem>>, %arg16: memref<1x1x32xf32, #tpu.memory_space<vmem>>, %arg17: memref<1x32xf32, #tpu.memory_space<vmem>>, %arg18: memref<1x32xf32, #tpu.memory_space<vmem>>, %arg19: memref<32x16xbf16, #tpu.memory_space<vmem>>, %arg20: memref<1x16xf32, #tpu.memory_space<vmem>>, %arg21: memref<1x1x16xf32, #tpu.memory_space<vmem>>, %arg22: memref<1x8x32xf32, #tpu.memory_space<vmem>>) attributes {dimension_semantics = [#tpu.dimension_semantics<parallel>, #tpu.dimension_semantics<arbitrary>], iteration_bounds = array<i64: 2, 2>, scalar_prefetch = 0 : i64, scratch_operands = 1 : i64, tpu.core_type = #tpu.core_type<tc>, window_params = [{transform_indices = @transform_0, window_bounds = array<i64: 1, 8, 32>}, {transform_indices = @transform_1, window_bounds = array<i64: 1, 1, 8>}, {transform_indices = @transform_2, window_bounds = array<i64: 1, 1, 8>}, {transform_indices = @transform_3, window_bounds = array<i64: 1, 32, 96>}, {transform_indices = @transform_4, window_bounds = array<i64: 1, 1, 96>}, {transform_indices = @transform_5, window_bounds = array<i64: 1, 32, 32>}, {transform_indices = @transform_6, window_bounds = array<i64: 1, 1, 32>}, {transform_indices = @transform_7, window_bounds = array<i64: 1, 1, 32>}, {transform_indices = @transform_8, window_bounds = array<i64: 1, 1, 32>}, {transform_indices = @transform_9, window_bounds = array<i64: 1, 32, 64>}, {transform_indices = @transform_10, window_bounds = array<i64: 1, 1, 64>}, {transform_indices = @transform_11, window_bounds = array<i64: 1, 64, 32>}, {transform_indices = @transform_12, window_bounds = array<i64: 1, 1, 32>}, {transform_indices = @transform_13, window_bounds = array<i64: 1, 1, 32>}, {transform_indices = @transform_14, window_bounds = array<i64: 1, 1, 32>}, {pipeline_mode = #tpu.pipeline_mode<synchronous>, transform_indices = @transform_15, window_bounds = array<i64: 1, 32>}, {pipeline_mode = #tpu.pipeline_mode<synchronous>, transform_indices = @transform_16, window_bounds = array<i64: 1, 32>}, {pipeline_mode = #tpu.pipeline_mode<synchronous>, transform_indices = @transform_17, window_bounds = array<i64: 32, 16>}, {pipeline_mode = #tpu.pipeline_mode<synchronous>, transform_indices = @transform_18, window_bounds = array<i64: 1, 16>}, {transform_indices = @transform_19, window_bounds = array<i64: 1, 1, 16>}]} {
    %c0_i32 = arith.constant 0 : i32
    %0 = arith.cmpi eq, %arg1, %c0_i32 : i32
    %1 = arith.extui %0 : i1 to i32
    %c0_i32_0 = arith.constant 0 : i32
    %2 = arith.cmpi ne, %1, %c0_i32_0 : i32
    scf.if %2 {
      %c0_83 = arith.constant 0 : index
      %c0_84 = arith.constant 0 : index
      %c0_85 = arith.constant 0 : index
      %209 = vector.load %arg2[%c0_83, %c0_84, %c0_85] : memref<1x8x32xf32, #tpu.memory_space<vmem>>, vector<1x8x32xf32>
      %c0_86 = arith.constant 0 : index
      %c0_87 = arith.constant 0 : index
      %c0_88 = arith.constant 0 : index
      %210 = vector.load %arg22[%c0_86, %c0_87, %c0_88] : memref<1x8x32xf32, #tpu.memory_space<vmem>>, vector<1x8x32xf32>
      tpu.vector_store %arg22[%c0_86, %c0_87, %c0_88], %209 {strides = array<i32>} : memref<1x8x32xf32, #tpu.memory_space<vmem>>, vector<1x8x32xf32>,
    } else {
    }
    %c0 = arith.constant 0 : index
    %c0_1 = arith.constant 0 : index
    %c0_2 = arith.constant 0 : index
    %3 = vector.load %arg22[%c0, %c0_1, %c0_2] : memref<1x8x32xf32, #tpu.memory_space<vmem>>, vector<1x8x32xf32>
    %4 = arith.truncf %3 : vector<1x8x32xf32> to vector<1x8x32xbf16>
    %c0_3 = arith.constant 0 : index
    %c0_4 = arith.constant 0 : index
    %c0_5 = arith.constant 0 : index
    %5 = vector.load %arg5[%c0_3, %c0_4, %c0_5] : memref<1x32x96xbf16, #tpu.memory_space<vmem>>, vector<1x32x96xbf16>
    %6 = vector.shape_cast %5 : vector<1x32x96xbf16> to vector<32x96xbf16>
    "tpu.trace_start"() <{level = 10 : i32, message = "bsd,de->bse"}> : () -> ()
    %cst = arith.constant dense<0.000000e+00> : vector<1x8x96xf32>
    %7 = tpu.matmul %4, %6, %cst {dimension_numbers = #tpu.dot_dimension_numbers<[2], [0], [0, 1], [1], [0, 0, 0, 1, 1, 1], [], []>} : vector<1x8x32xbf16>, vector<32x96xbf16>, vector<1x8x96xf32> -> vector<1x8x96xf32>
    "tpu.trace_stop"() : () -> ()
    %c0_6 = arith.constant 0 : index
    %c0_7 = arith.constant 0 : index
    %c0_8 = arith.constant 0 : index
    %8 = vector.load %arg6[%c0_6, %c0_7, %c0_8] : memref<1x1x96xf32, #tpu.memory_space<vmem>>, vector<1x1x96xf32>
    %9 = vector.shape_cast %8 : vector<1x1x96xf32> to vector<1x96xf32>
    %10 = vector.shape_cast %9 : vector<1x96xf32> to vector<1x1x96xf32>
    %11 = vector.broadcast %10 : vector<1x1x96xf32> to vector<1x8x96xf32>
    %12 = arith.addf %7, %11 : vector<1x8x96xf32>
    %c0_9 = arith.constant 0 : index
    %c0_10 = arith.constant 0 : index
    %c0_11 = arith.constant 0 : index
    %13 = vector.load %arg3[%c0_9, %c0_10, %c0_11] : memref<1x1x8xf32, #tpu.memory_space<vmem>>, vector<1x1x8xf32>
    %14 = vector.extract_strided_slice %12 {offsets = [0, 0, 0], sizes = [1, 8, 8], strides = [1, 1, 1]} : vector<1x8x96xf32> to vector<1x8x8xf32>
    %15 = vector.extract_strided_slice %12 {offsets = [0, 0, 32], sizes = [1, 8, 8], strides = [1, 1, 1]} : vector<1x8x96xf32> to vector<1x8x8xf32>
    %16 = vector.extract_strided_slice %12 {offsets = [0, 0, 64], sizes = [1, 8, 8], strides = [1, 1, 1]} : vector<1x8x96xf32> to vector<1x8x8xf32>
    %17 = arith.truncf %14 : vector<1x8x8xf32> to vector<1x8x8xbf16>
    %18 = arith.truncf %15 : vector<1x8x8xf32> to vector<1x8x8xbf16>
    "tpu.trace_start"() <{level = 10 : i32, message = "bqd,bkd->bqk"}> : () -> ()
    %cst_12 = arith.constant dense<0.000000e+00> : vector<1x8x8xf32>
    %19 = tpu.matmul %17, %18, %cst_12 {dimension_numbers = #tpu.dot_dimension_numbers<[2], [2], [1], [1], [0, 0, 0, 1, 1, 1], [0], [0]>} : vector<1x8x8xbf16>, vector<1x8x8xbf16>, vector<1x8x8xf32> -> vector<1x8x8xf32>
    "tpu.trace_stop"() : () -> ()
    %cst_13 = arith.constant 0.353553385 : f32
    %20 = vector.broadcast %cst_13 : f32 to vector<1x8x8xf32>
    %21 = arith.mulf %19, %20 : vector<1x8x8xf32>
    %22 = vector.broadcast %13 : vector<1x1x8xf32> to vector<1x8x8xf32>
    %23 = arith.addf %21, %22 : vector<1x8x8xf32>
    %cst_14 = arith.constant dense<0xFF800000> : vector<1x8xf32>
    %24 = vector.multi_reduction <maximumf>, %23, %cst_14 [2] : vector<1x8x8xf32> to vector<1x8xf32>
    %25 = vector.shape_cast %24 : vector<1x8xf32> to vector<1x8x1xf32>
    %26 = vector.broadcast %25 : vector<1x8x1xf32> to vector<1x8x8xf32>
    %27 = arith.subf %23, %26 : vector<1x8x8xf32>
    %28 = math.exp %27 : vector<1x8x8xf32>
    %cst_15 = arith.constant dense<0.000000e+00> : vector<1x8xf32>
    %29 = vector.multi_reduction <add>, %28, %cst_15 [2] : vector<1x8x8xf32> to vector<1x8xf32>
    %30 = vector.shape_cast %29 : vector<1x8xf32> to vector<1x8x1xf32>
    %31 = tpu.reciprocal %30 {approx = true} : vector<1x8x1xf32> -> vector<1x8x1xf32>
    %32 = vector.broadcast %31 : vector<1x8x1xf32> to vector<1x8x8xf32>
    %33 = arith.mulf %28, %32 : vector<1x8x8xf32>
    %34 = arith.truncf %33 : vector<1x8x8xf32> to vector<1x8x8xbf16>
    %35 = arith.truncf %16 : vector<1x8x8xf32> to vector<1x8x8xbf16>
    "tpu.trace_start"() <{level = 10 : i32, message = "bqk,bkd->bqd"}> : () -> ()
    %cst_16 = arith.constant dense<0.000000e+00> : vector<1x8x8xf32>
    %36 = tpu.matmul %34, %35, %cst_16 {dimension_numbers = #tpu.dot_dimension_numbers<[2], [1], [1], [2], [0, 0, 0, 1, 1, 2], [0], [0]>} : vector<1x8x8xbf16>, vector<1x8x8xbf16>, vector<1x8x8xf32> -> vector<1x8x8xf32>
    "tpu.trace_stop"() : () -> ()
    %37 = vector.extract_strided_slice %12 {offsets = [0, 0, 8], sizes = [1, 8, 8], strides = [1, 1, 1]} : vector<1x8x96xf32> to vector<1x8x8xf32>
    %38 = vector.extract_strided_slice %12 {offsets = [0, 0, 40], sizes = [1, 8, 8], strides = [1, 1, 1]} : vector<1x8x96xf32> to vector<1x8x8xf32>
    %39 = vector.extract_strided_slice %12 {offsets = [0, 0, 72], sizes = [1, 8, 8], strides = [1, 1, 1]} : vector<1x8x96xf32> to vector<1x8x8xf32>
    %40 = arith.truncf %37 : vector<1x8x8xf32> to vector<1x8x8xbf16>
    %41 = arith.truncf %38 : vector<1x8x8xf32> to vector<1x8x8xbf16>
    "tpu.trace_start"() <{level = 10 : i32, message = "bqd,bkd->bqk"}> : () -> ()
    %cst_17 = arith.constant dense<0.000000e+00> : vector<1x8x8xf32>
    %42 = tpu.matmul %40, %41, %cst_17 {dimension_numbers = #tpu.dot_dimension_numbers<[2], [2], [1], [1], [0, 0, 0, 1, 1, 1], [0], [0]>} : vector<1x8x8xbf16>, vector<1x8x8xbf16>, vector<1x8x8xf32> -> vector<1x8x8xf32>
    "tpu.trace_stop"() : () -> ()
    %cst_18 = arith.constant 0.353553385 : f32
    %43 = vector.broadcast %cst_18 : f32 to vector<1x8x8xf32>
    %44 = arith.mulf %42, %43 : vector<1x8x8xf32>
    %45 = vector.broadcast %13 : vector<1x1x8xf32> to vector<1x8x8xf32>
    %46 = arith.addf %44, %45 : vector<1x8x8xf32>
    %cst_19 = arith.constant dense<0xFF800000> : vector<1x8xf32>
    %47 = vector.multi_reduction <maximumf>, %46, %cst_19 [2] : vector<1x8x8xf32> to vector<1x8xf32>
    %48 = vector.shape_cast %47 : vector<1x8xf32> to vector<1x8x1xf32>
    %49 = vector.broadcast %48 : vector<1x8x1xf32> to vector<1x8x8xf32>
    %50 = arith.subf %46, %49 : vector<1x8x8xf32>
    %51 = math.exp %50 : vector<1x8x8xf32>
    %cst_20 = arith.constant dense<0.000000e+00> : vector<1x8xf32>
    %52 = vector.multi_reduction <add>, %51, %cst_20 [2] : vector<1x8x8xf32> to vector<1x8xf32>
    %53 = vector.shape_cast %52 : vector<1x8xf32> to vector<1x8x1xf32>
    %54 = tpu.reciprocal %53 {approx = true} : vector<1x8x1xf32> -> vector<1x8x1xf32>
    %55 = vector.broadcast %54 : vector<1x8x1xf32> to vector<1x8x8xf32>
    %56 = arith.mulf %51, %55 : vector<1x8x8xf32>
    %57 = arith.truncf %56 : vector<1x8x8xf32> to vector<1x8x8xbf16>
    %58 = arith.truncf %39 : vector<1x8x8xf32> to vector<1x8x8xbf16>
    "tpu.trace_start"() <{level = 10 : i32, message = "bqk,bkd->bqd"}> : () -> ()
    %cst_21 = arith.constant dense<0.000000e+00> : vector<1x8x8xf32>
    %59 = tpu.matmul %57, %58, %cst_21 {dimension_numbers = #tpu.dot_dimension_numbers<[2], [1], [1], [2], [0, 0, 0, 1, 1, 2], [0], [0]>} : vector<1x8x8xbf16>, vector<1x8x8xbf16>, vector<1x8x8xf32> -> vector<1x8x8xf32>
    "tpu.trace_stop"() : () -> ()
    %60 = vector.extract_strided_slice %12 {offsets = [0, 0, 16], sizes = [1, 8, 8], strides = [1, 1, 1]} : vector<1x8x96xf32> to vector<1x8x8xf32>
    %61 = vector.extract_strided_slice %12 {offsets = [0, 0, 48], sizes = [1, 8, 8], strides = [1, 1, 1]} : vector<1x8x96xf32> to vector<1x8x8xf32>
    %62 = vector.extract_strided_slice %12 {offsets = [0, 0, 80], sizes = [1, 8, 8], strides = [1, 1, 1]} : vector<1x8x96xf32> to vector<1x8x8xf32>
    %63 = arith.truncf %60 : vector<1x8x8xf32> to vector<1x8x8xbf16>
    %64 = arith.truncf %61 : vector<1x8x8xf32> to vector<1x8x8xbf16>
    "tpu.trace_start"() <{level = 10 : i32, message = "bqd,bkd->bqk"}> : () -> ()
    %cst_22 = arith.constant dense<0.000000e+00> : vector<1x8x8xf32>
    %65 = tpu.matmul %63, %64, %cst_22 {dimension_numbers = #tpu.dot_dimension_numbers<[2], [2], [1], [1], [0, 0, 0, 1, 1, 1], [0], [0]>} : vector<1x8x8xbf16>, vector<1x8x8xbf16>, vector<1x8x8xf32> -> vector<1x8x8xf32>
    "tpu.trace_stop"() : () -> ()
    %cst_23 = arith.constant 0.353553385 : f32
    %66 = vector.broadcast %cst_23 : f32 to vector<1x8x8xf32>
    %67 = arith.mulf %65, %66 : vector<1x8x8xf32>
    %68 = vector.broadcast %13 : vector<1x1x8xf32> to vector<1x8x8xf32>
    %69 = arith.addf %67, %68 : vector<1x8x8xf32>
    %cst_24 = arith.constant dense<0xFF800000> : vector<1x8xf32>
    %70 = vector.multi_reduction <maximumf>, %69, %cst_24 [2] : vector<1x8x8xf32> to vector<1x8xf32>
    %71 = vector.shape_cast %70 : vector<1x8xf32> to vector<1x8x1xf32>
    %72 = vector.broadcast %71 : vector<1x8x1xf32> to vector<1x8x8xf32>
    %73 = arith.subf %69, %72 : vector<1x8x8xf32>
    %74 = math.exp %73 : vector<1x8x8xf32>
    %cst_25 = arith.constant dense<0.000000e+00> : vector<1x8xf32>
    %75 = vector.multi_reduction <add>, %74, %cst_25 [2] : vector<1x8x8xf32> to vector<1x8xf32>
    %76 = vector.shape_cast %75 : vector<1x8xf32> to vector<1x8x1xf32>
    %77 = tpu.reciprocal %76 {approx = true} : vector<1x8x1xf32> -> vector<1x8x1xf32>
    %78 = vector.broadcast %77 : vector<1x8x1xf32> to vector<1x8x8xf32>
    %79 = arith.mulf %74, %78 : vector<1x8x8xf32>
    %80 = arith.truncf %79 : vector<1x8x8xf32> to vector<1x8x8xbf16>
    %81 = arith.truncf %62 : vector<1x8x8xf32> to vector<1x8x8xbf16>
    "tpu.trace_start"() <{level = 10 : i32, message = "bqk,bkd->bqd"}> : () -> ()
    %cst_26 = arith.constant dense<0.000000e+00> : vector<1x8x8xf32>
    %82 = tpu.matmul %80, %81, %cst_26 {dimension_numbers = #tpu.dot_dimension_numbers<[2], [1], [1], [2], [0, 0, 0, 1, 1, 2], [0], [0]>} : vector<1x8x8xbf16>, vector<1x8x8xbf16>, vector<1x8x8xf32> -> vector<1x8x8xf32>
    "tpu.trace_stop"() : () -> ()
    %83 = vector.extract_strided_slice %12 {offsets = [0, 0, 24], sizes = [1, 8, 8], strides = [1, 1, 1]} : vector<1x8x96xf32> to vector<1x8x8xf32>
    %84 = vector.extract_strided_slice %12 {offsets = [0, 0, 56], sizes = [1, 8, 8], strides = [1, 1, 1]} : vector<1x8x96xf32> to vector<1x8x8xf32>
    %85 = vector.extract_strided_slice %12 {offsets = [0, 0, 88], sizes = [1, 8, 8], strides = [1, 1, 1]} : vector<1x8x96xf32> to vector<1x8x8xf32>
    %86 = arith.truncf %83 : vector<1x8x8xf32> to vector<1x8x8xbf16>
    %87 = arith.truncf %84 : vector<1x8x8xf32> to vector<1x8x8xbf16>
    "tpu.trace_start"() <{level = 10 : i32, message = "bqd,bkd->bqk"}> : () -> ()
    %cst_27 = arith.constant dense<0.000000e+00> : vector<1x8x8xf32>
    %88 = tpu.matmul %86, %87, %cst_27 {dimension_numbers = #tpu.dot_dimension_numbers<[2], [2], [1], [1], [0, 0, 0, 1, 1, 1], [0], [0]>} : vector<1x8x8xbf16>, vector<1x8x8xbf16>, vector<1x8x8xf32> -> vector<1x8x8xf32>
    "tpu.trace_stop"() : () -> ()
    %cst_28 = arith.constant 0.353553385 : f32
    %89 = vector.broadcast %cst_28 : f32 to vector<1x8x8xf32>
    %90 = arith.mulf %88, %89 : vector<1x8x8xf32>
    %91 = vector.broadcast %13 : vector<1x1x8xf32> to vector<1x8x8xf32>
    %92 = arith.addf %90, %91 : vector<1x8x8xf32>
    %cst_29 = arith.constant dense<0xFF800000> : vector<1x8xf32>
    %93 = vector.multi_reduction <maximumf>, %92, %cst_29 [2] : vector<1x8x8xf32> to vector<1x8xf32>
    %94 = vector.shape_cast %93 : vector<1x8xf32> to vector<1x8x1xf32>
    %95 = vector.broadcast %94 : vector<1x8x1xf32> to vector<1x8x8xf32>
    %96 = arith.subf %92, %95 : vector<1x8x8xf32>
    %97 = math.exp %96 : vector<1x8x8xf32>
    %cst_30 = arith.constant dense<0.000000e+00> : vector<1x8xf32>
    %98 = vector.multi_reduction <add>, %97, %cst_30 [2] : vector<1x8x8xf32> to vector<1x8xf32>
    %99 = vector.shape_cast %98 : vector<1x8xf32> to vector<1x8x1xf32>
    %100 = tpu.reciprocal %99 {approx = true} : vector<1x8x1xf32> -> vector<1x8x1xf32>
    %101 = vector.broadcast %100 : vector<1x8x1xf32> to vector<1x8x8xf32>
    %102 = arith.mulf %97, %101 : vector<1x8x8xf32>
    %103 = arith.truncf %102 : vector<1x8x8xf32> to vector<1x8x8xbf16>
    %104 = arith.truncf %85 : vector<1x8x8xf32> to vector<1x8x8xbf16>
    "tpu.trace_start"() <{level = 10 : i32, message = "bqk,bkd->bqd"}> : () -> ()
    %cst_31 = arith.constant dense<0.000000e+00> : vector<1x8x8xf32>
    %105 = tpu.matmul %103, %104, %cst_31 {dimension_numbers = #tpu.dot_dimension_numbers<[2], [1], [1], [2], [0, 0, 0, 1, 1, 2], [0], [0]>} : vector<1x8x8xbf16>, vector<1x8x8xbf16>, vector<1x8x8xf32> -> vector<1x8x8xf32>
    "tpu.trace_stop"() : () -> ()
    %106 = tpu.concatenate %36, %59, %82, %105 in 2 : vector<1x8x8xf32>, vector<1x8x8xf32>, vector<1x8x8xf32>, vector<1x8x8xf32> -> vector<1x8x32xf32>
    %107 = arith.truncf %106 : vector<1x8x32xf32> to vector<1x8x32xbf16>
    %c0_32 = arith.constant 0 : index
    %c0_33 = arith.constant 0 : index
    %c0_34 = arith.constant 0 : index
    %108 = vector.load %arg7[%c0_32, %c0_33, %c0_34] : memref<1x32x32xbf16, #tpu.memory_space<vmem>>, vector<1x32x32xbf16>
    %109 = vector.shape_cast %108 : vector<1x32x32xbf16> to vector<32x32xbf16>
    "tpu.trace_start"() <{level = 10 : i32, message = "bsd,de->bse"}> : () -> ()
    %cst_35 = arith.constant dense<0.000000e+00> : vector<1x8x32xf32>
    %110 = tpu.matmul %107, %109, %cst_35 {dimension_numbers = #tpu.dot_dimension_numbers<[2], [0], [0, 1], [1], [0, 0, 0, 1, 1, 1], [], []>} : vector<1x8x32xbf16>, vector<32x32xbf16>, vector<1x8x32xf32> -> vector<1x8x32xf32>
    "tpu.trace_stop"() : () -> ()
    %c0_36 = arith.constant 0 : index
    %c0_37 = arith.constant 0 : index
    %c0_38 = arith.constant 0 : index
    %111 = vector.load %arg8[%c0_36, %c0_37, %c0_38] : memref<1x1x32xf32, #tpu.memory_space<vmem>>, vector<1x1x32xf32>
    %112 = vector.shape_cast %111 : vector<1x1x32xf32> to vector<1x32xf32>
    %113 = vector.shape_cast %112 : vector<1x32xf32> to vector<1x1x32xf32>
    %114 = vector.broadcast %113 : vector<1x1x32xf32> to vector<1x8x32xf32>
    %115 = arith.addf %110, %114 : vector<1x8x32xf32>
    %116 = arith.addf %3, %115 : vector<1x8x32xf32>
    %c0_39 = arith.constant 0 : index
    %c0_40 = arith.constant 0 : index
    %c0_41 = arith.constant 0 : index
    %117 = vector.load %arg9[%c0_39, %c0_40, %c0_41] : memref<1x1x32xf32, #tpu.memory_space<vmem>>, vector<1x1x32xf32>
    %118 = vector.shape_cast %117 : vector<1x1x32xf32> to vector<1x32xf32>
    %c0_42 = arith.constant 0 : index
    %c0_43 = arith.constant 0 : index
    %c0_44 = arith.constant 0 : index
    %119 = vector.load %arg10[%c0_42, %c0_43, %c0_44] : memref<1x1x32xf32, #tpu.memory_space<vmem>>, vector<1x1x32xf32>
    %120 = vector.shape_cast %119 : vector<1x1x32xf32> to vector<1x32xf32>
    %cst_45 = arith.constant dense<0.000000e+00> : vector<1x8xf32>
    %121 = vector.multi_reduction <add>, %116, %cst_45 [2] : vector<1x8x32xf32> to vector<1x8xf32>
    %122 = vector.shape_cast %121 : vector<1x8xf32> to vector<1x8x1xf32>
    %cst_46 = arith.constant 3.200000e+01 : f32
    %123 = vector.broadcast %cst_46 : f32 to vector<1x8x1xf32>
    %124 = arith.divf %122, %123 : vector<1x8x1xf32>
    %125 = vector.broadcast %124 : vector<1x8x1xf32> to vector<1x8x32xf32>
    %126 = arith.subf %116, %125 : vector<1x8x32xf32>
    %127 = arith.mulf %126, %126 : vector<1x8x32xf32>
    %cst_47 = arith.constant dense<0.000000e+00> : vector<1x8xf32>
    %128 = vector.multi_reduction <add>, %127, %cst_47 [2] : vector<1x8x32xf32> to vector<1x8xf32>
    %129 = vector.shape_cast %128 : vector<1x8xf32> to vector<1x8x1xf32>
    %cst_48 = arith.constant 3.200000e+01 : f32
    %130 = vector.broadcast %cst_48 : f32 to vector<1x8x1xf32>
    %131 = arith.divf %129, %130 : vector<1x8x1xf32>
    %132 = vector.broadcast %124 : vector<1x8x1xf32> to vector<1x8x32xf32>
    %133 = arith.subf %116, %132 : vector<1x8x32xf32>
    %cst_49 = arith.constant 9.99999974E-6 : f32
    %134 = vector.broadcast %cst_49 : f32 to vector<1x8x1xf32>
    %135 = arith.addf %131, %134 : vector<1x8x1xf32>
    %136 = math.rsqrt %135 : vector<1x8x1xf32>
    %137 = vector.broadcast %136 : vector<1x8x1xf32> to vector<1x8x32xf32>
    %138 = arith.mulf %133, %137 : vector<1x8x32xf32>
    %139 = vector.shape_cast %118 : vector<1x32xf32> to vector<1x1x32xf32>
    %140 = vector.broadcast %139 : vector<1x1x32xf32> to vector<1x8x32xf32>
    %141 = arith.mulf %138, %140 : vector<1x8x32xf32>
    %142 = vector.shape_cast %120 : vector<1x32xf32> to vector<1x1x32xf32>
    %143 = vector.broadcast %142 : vector<1x1x32xf32> to vector<1x8x32xf32>
    %144 = arith.addf %141, %143 : vector<1x8x32xf32>
    %145 = arith.truncf %144 : vector<1x8x32xf32> to vector<1x8x32xbf16>
    %c0_50 = arith.constant 0 : index
    %c0_51 = arith.constant 0 : index
    %c0_52 = arith.constant 0 : index
    %146 = vector.load %arg11[%c0_50, %c0_51, %c0_52] : memref<1x32x64xbf16, #tpu.memory_space<vmem>>, vector<1x32x64xbf16>
    %147 = vector.shape_cast %146 : vector<1x32x64xbf16> to vector<32x64xbf16>
    "tpu.trace_start"() <{level = 10 : i32, message = "bsd,de->bse"}> : () -> ()
    %cst_53 = arith.constant dense<0.000000e+00> : vector<1x8x64xf32>
    %148 = tpu.matmul %145, %147, %cst_53 {dimension_numbers = #tpu.dot_dimension_numbers<[2], [0], [0, 1], [1], [0, 0, 0, 1, 1, 1], [], []>} : vector<1x8x32xbf16>, vector<32x64xbf16>, vector<1x8x64xf32> -> vector<1x8x64xf32>
    "tpu.trace_stop"() : () -> ()
    %c0_54 = arith.constant 0 : index
    %c0_55 = arith.constant 0 : index
    %c0_56 = arith.constant 0 : index
    %149 = vector.load %arg12[%c0_54, %c0_55, %c0_56] : memref<1x1x64xf32, #tpu.memory_space<vmem>>, vector<1x1x64xf32>
    %150 = vector.shape_cast %149 : vector<1x1x64xf32> to vector<1x64xf32>
    %151 = vector.shape_cast %150 : vector<1x64xf32> to vector<1x1x64xf32>
    %152 = vector.broadcast %151 : vector<1x1x64xf32> to vector<1x8x64xf32>
    %153 = arith.addf %148, %152 : vector<1x8x64xf32>
    %154 = arith.mulf %153, %153 : vector<1x8x64xf32>
    %155 = arith.mulf %153, %154 : vector<1x8x64xf32>
    %cst_57 = arith.constant 4.471500e-02 : f32
    %156 = vector.broadcast %cst_57 : f32 to vector<1x8x64xf32>
    %157 = arith.mulf %156, %155 : vector<1x8x64xf32>
    %158 = arith.addf %153, %157 : vector<1x8x64xf32>
    %cst_58 = arith.constant 0.797884583 : f32
    %159 = vector.broadcast %cst_58 : f32 to vector<1x8x64xf32>
    %160 = arith.mulf %159, %158 : vector<1x8x64xf32>
    %161 = math.tanh %160 : vector<1x8x64xf32>
    %cst_59 = arith.constant 1.000000e+00 : f32
    %162 = vector.broadcast %cst_59 : f32 to vector<1x8x64xf32>
    %163 = arith.addf %162, %161 : vector<1x8x64xf32>
    %cst_60 = arith.constant 5.000000e-01 : f32
    %164 = vector.broadcast %cst_60 : f32 to vector<1x8x64xf32>
    %165 = arith.mulf %164, %163 : vector<1x8x64xf32>
    %166 = arith.mulf %153, %165 : vector<1x8x64xf32>
    %167 = arith.truncf %166 : vector<1x8x64xf32> to vector<1x8x64xbf16>
    %c0_61 = arith.constant 0 : index
    %c0_62 = arith.constant 0 : index
    %c0_63 = arith.constant 0 : index
    %168 = vector.load %arg13[%c0_61, %c0_62, %c0_63] : memref<1x64x32xbf16, #tpu.memory_space<vmem>>, vector<1x64x32xbf16>
    %169 = vector.shape_cast %168 : vector<1x64x32xbf16> to vector<64x32xbf16>
    "tpu.trace_start"() <{level = 10 : i32, message = "bse,ed->bsd"}> : () -> ()
    %cst_64 = arith.constant dense<0.000000e+00> : vector<1x8x32xf32>
    %170 = tpu.matmul %167, %169, %cst_64 {dimension_numbers = #tpu.dot_dimension_numbers<[2], [0], [0, 1], [1], [0, 0, 0, 1, 1, 1], [], []>} : vector<1x8x64xbf16>, vector<64x32xbf16>, vector<1x8x32xf32> -> vector<1x8x32xf32>
    "tpu.trace_stop"() : () -> ()
    %c0_65 = arith.constant 0 : index
    %c0_66 = arith.constant 0 : index
    %c0_67 = arith.constant 0 : index
    %171 = vector.load %arg14[%c0_65, %c0_66, %c0_67] : memref<1x1x32xf32, #tpu.memory_space<vmem>>, vector<1x1x32xf32>
    %172 = vector.shape_cast %171 : vector<1x1x32xf32> to vector<1x32xf32>
    %173 = vector.shape_cast %172 : vector<1x32xf32> to vector<1x1x32xf32>
    %174 = vector.broadcast %173 : vector<1x1x32xf32> to vector<1x8x32xf32>
    %175 = arith.addf %170, %174 : vector<1x8x32xf32>
    %176 = arith.addf %144, %175 : vector<1x8x32xf32>
    %c0_68 = arith.constant 0 : index
    %c0_69 = arith.constant 0 : index
    %c0_70 = arith.constant 0 : index
    %177 = vector.load %arg15[%c0_68, %c0_69, %c0_70] : memref<1x1x32xf32, #tpu.memory_space<vmem>>, vector<1x1x32xf32>
    %178 = vector.shape_cast %177 : vector<1x1x32xf32> to vector<1x32xf32>
    %c0_71 = arith.constant 0 : index
    %c0_72 = arith.constant 0 : index
    %c0_73 = arith.constant 0 : index
    %179 = vector.load %arg16[%c0_71, %c0_72, %c0_73] : memref<1x1x32xf32, #tpu.memory_space<vmem>>, vector<1x1x32xf32>
    %180 = vector.shape_cast %179 : vector<1x1x32xf32> to vector<1x32xf32>
    %cst_74 = arith.constant dense<0.000000e+00> : vector<1x8xf32>
    %181 = vector.multi_reduction <add>, %176, %cst_74 [2] : vector<1x8x32xf32> to vector<1x8xf32>
    %182 = vector.shape_cast %181 : vector<1x8xf32> to vector<1x8x1xf32>
    %cst_75 = arith.constant 3.200000e+01 : f32
    %183 = vector.broadcast %cst_75 : f32 to vector<1x8x1xf32>
    %184 = arith.divf %182, %183 : vector<1x8x1xf32>
    %185 = vector.broadcast %184 : vector<1x8x1xf32> to vector<1x8x32xf32>
    %186 = arith.subf %176, %185 : vector<1x8x32xf32>
    %187 = arith.mulf %186, %186 : vector<1x8x32xf32>
    %cst_76 = arith.constant dense<0.000000e+00> : vector<1x8xf32>
    %188 = vector.multi_reduction <add>, %187, %cst_76 [2] : vector<1x8x32xf32> to vector<1x8xf32>
    %189 = vector.shape_cast %188 : vector<1x8xf32> to vector<1x8x1xf32>
    %cst_77 = arith.constant 3.200000e+01 : f32
    %190 = vector.broadcast %cst_77 : f32 to vector<1x8x1xf32>
    %191 = arith.divf %189, %190 : vector<1x8x1xf32>
    %192 = vector.broadcast %184 : vector<1x8x1xf32> to vector<1x8x32xf32>
    %193 = arith.subf %176, %192 : vector<1x8x32xf32>
    %cst_78 = arith.constant 9.99999974E-6 : f32
    %194 = vector.broadcast %cst_78 : f32 to vector<1x8x1xf32>
    %195 = arith.addf %191, %194 : vector<1x8x1xf32>
    %196 = math.rsqrt %195 : vector<1x8x1xf32>
    %197 = vector.broadcast %196 : vector<1x8x1xf32> to vector<1x8x32xf32>
    %198 = arith.mulf %193, %197 : vector<1x8x32xf32>
    %199 = vector.shape_cast %178 : vector<1x32xf32> to vector<1x1x32xf32>
    %200 = vector.broadcast %199 : vector<1x1x32xf32> to vector<1x8x32xf32>
    %201 = arith.mulf %198, %200 : vector<1x8x32xf32>
    %202 = vector.shape_cast %180 : vector<1x32xf32> to vector<1x1x32xf32>
    %203 = vector.broadcast %202 : vector<1x1x32xf32> to vector<1x8x32xf32>
    %204 = arith.addf %201, %203 : vector<1x8x32xf32>
    %c0_79 = arith.constant 0 : index
    %c0_80 = arith.constant 0 : index
    %c0_81 = arith.constant 0 : index
    %205 = vector.load %arg22[%c0_79, %c0_80, %c0_81] : memref<1x8x32xf32, #tpu.memory_space<vmem>>, vector<1x8x32xf32>
    tpu.vector_store %arg22[%c0_79, %c0_80, %c0_81], %204 {strides = array<i32>} : memref<1x8x32xf32, #tpu.memory_space<vmem>>, vector<1x8x32xf32>,
    %c1_i32 = arith.constant 1 : i32
    %206 = arith.cmpi eq, %arg1, %c1_i32 : i32
    %207 = arith.extui %206 : i1 to i32
    %c0_i32_82 = arith.constant 0 : i32
    %208 = arith.cmpi ne, %207, %c0_i32_82 : i32
    scf.if %208 {
      %c0_83 = arith.constant 0 : index
      %c0_84 = arith.constant 0 : index
      %c0_85 = arith.constant 0 : index
      %209 = vector.load %arg4[%c0_83, %c0_84, %c0_85] : memref<1x1x8xf32, #tpu.memory_space<vmem>>, vector<1x1x8xf32>
      %210 = vector.shape_cast %209 : vector<1x1x8xf32> to vector<1x8xf32>
      %211 = vector.shape_cast %210 : vector<1x8xf32> to vector<1x8x1xf32>
      %212 = vector.broadcast %211 : vector<1x8x1xf32> to vector<1x8x32xf32>
      %213 = arith.mulf %212, %204 : vector<1x8x32xf32>
      %cst_86 = arith.constant dense<0.000000e+00> : vector<1x32xf32>
      %214 = vector.multi_reduction <add>, %213, %cst_86 [1] : vector<1x8x32xf32> to vector<1x32xf32>
      %215 = vector.shape_cast %214 : vector<1x32xf32> to vector<1x1x32xf32>
      %c0_87 = arith.constant 0 : index
      %c0_88 = arith.constant 0 : index
      %216 = vector.load %arg17[%c0_87, %c0_88] : memref<1x32xf32, #tpu.memory_space<vmem>>, vector<1x32xf32>
      %c0_89 = arith.constant 0 : index
      %c0_90 = arith.constant 0 : index
      %217 = vector.load %arg18[%c0_89, %c0_90] : memref<1x32xf32, #tpu.memory_space<vmem>>, vector<1x32xf32>
      %cst_91 = arith.constant dense<0.000000e+00> : vector<1x1xf32>
      %218 = vector.multi_reduction <add>, %215, %cst_91 [2] : vector<1x1x32xf32> to vector<1x1xf32>
      %219 = vector.shape_cast %218 : vector<1x1xf32> to vector<1x1x1xf32>
      %cst_92 = arith.constant 3.200000e+01 : f32
      %220 = vector.broadcast %cst_92 : f32 to vector<1x1x1xf32>
      %221 = arith.divf %219, %220 : vector<1x1x1xf32>
      %222 = vector.broadcast %221 : vector<1x1x1xf32> to vector<1x1x32xf32>
      %223 = arith.subf %215, %222 : vector<1x1x32xf32>
      %224 = arith.mulf %223, %223 : vector<1x1x32xf32>
      %cst_93 = arith.constant dense<0.000000e+00> : vector<1x1xf32>
      %225 = vector.multi_reduction <add>, %224, %cst_93 [2] : vector<1x1x32xf32> to vector<1x1xf32>
      %226 = vector.shape_cast %225 : vector<1x1xf32> to vector<1x1x1xf32>
      %cst_94 = arith.constant 3.200000e+01 : f32
      %227 = vector.broadcast %cst_94 : f32 to vector<1x1x1xf32>
      %228 = arith.divf %226, %227 : vector<1x1x1xf32>
      %229 = vector.broadcast %221 : vector<1x1x1xf32> to vector<1x1x32xf32>
      %230 = arith.subf %215, %229 : vector<1x1x32xf32>
      %cst_95 = arith.constant 9.99999974E-6 : f32
      %231 = vector.broadcast %cst_95 : f32 to vector<1x1x1xf32>
      %232 = arith.addf %228, %231 : vector<1x1x1xf32>
      %233 = math.rsqrt %232 : vector<1x1x1xf32>
      %234 = vector.broadcast %233 : vector<1x1x1xf32> to vector<1x1x32xf32>
      %235 = arith.mulf %230, %234 : vector<1x1x32xf32>
      %236 = vector.shape_cast %216 : vector<1x32xf32> to vector<1x1x32xf32>
      %237 = arith.mulf %235, %236 : vector<1x1x32xf32>
      %238 = vector.shape_cast %217 : vector<1x32xf32> to vector<1x1x32xf32>
      %239 = arith.addf %237, %238 : vector<1x1x32xf32>
      %240 = arith.truncf %239 : vector<1x1x32xf32> to vector<1x1x32xbf16>
      %c0_96 = arith.constant 0 : index
      %c0_97 = arith.constant 0 : index
      %241 = vector.load %arg19[%c0_96, %c0_97] : memref<32x16xbf16, #tpu.memory_space<vmem>>, vector<32x16xbf16>
      "tpu.trace_start"() <{level = 10 : i32, message = "bad,de->bae"}> : () -> ()
      %cst_98 = arith.constant dense<0.000000e+00> : vector<1x1x16xf32>
      %242 = tpu.matmul %240, %241, %cst_98 {dimension_numbers = #tpu.dot_dimension_numbers<[2], [0], [0, 1], [1], [0, 0, 0, 1, 1, 1], [], []>} : vector<1x1x32xbf16>, vector<32x16xbf16>, vector<1x1x16xf32> -> vector<1x1x16xf32>
      "tpu.trace_stop"() : () -> ()
      %c0_99 = arith.constant 0 : index
      %c0_100 = arith.constant 0 : index
      %243 = vector.load %arg20[%c0_99, %c0_100] : memref<1x16xf32, #tpu.memory_space<vmem>>, vector<1x16xf32>
      %244 = vector.shape_cast %243 : vector<1x16xf32> to vector<1x1x16xf32>
      %245 = arith.addf %242, %244 : vector<1x1x16xf32>
      %c0_101 = arith.constant 0 : index
      %c0_102 = arith.constant 0 : index
      %c0_103 = arith.constant 0 : index
      %246 = vector.load %arg21[%c0_101, %c0_102, %c0_103] : memref<1x1x16xf32, #tpu.memory_space<vmem>>, vector<1x1x16xf32>
      tpu.vector_store %arg21[%c0_101, %c0_102, %c0_103], %245 {strides = array<i32>} : memref<1x1x16xf32, #tpu.memory_space<vmem>>, vector<1x1x16xf32>,
    } else {
    }
    return
  }
  func.func @transform_0(%arg0: i32, %arg1: i32) -> (i32, i32, i32) {
    %c0_i32 = arith.constant 0 : i32
    %c0_i32_0 = arith.constant 0 : i32
    %c0_i32_1 = arith.constant 0 : i32
    return %arg0, %c0_i32, %c0_i32_0 : i32, i32, i32
  }
  func.func @transform_1(%arg0: i32, %arg1: i32) -> (i32, i32, i32) {
    %c0_i32 = arith.constant 0 : i32
    %c0_i32_0 = arith.constant 0 : i32
    %c0_i32_1 = arith.constant 0 : i32
    return %arg0, %c0_i32, %c0_i32_0 : i32, i32, i32
  }
  func.func @transform_2(%arg0: i32, %arg1: i32) -> (i32, i32, i32) {
    %c0_i32 = arith.constant 0 : i32
    %c0_i32_0 = arith.constant 0 : i32
    %c0_i32_1 = arith.constant 0 : i32
    return %arg0, %c0_i32, %c0_i32_0 : i32, i32, i32
  }
  func.func @transform_3(%arg0: i32, %arg1: i32) -> (i32, i32, i32) {
    %c0_i32 = arith.constant 0 : i32
    %c0_i32_0 = arith.constant 0 : i32
    %c0_i32_1 = arith.constant 0 : i32
    return %arg1, %c0_i32, %c0_i32_0 : i32, i32, i32
  }
  func.func @transform_4(%arg0: i32, %arg1: i32) -> (i32, i32, i32) {
    %c0_i32 = arith.constant 0 : i32
    %c0_i32_0 = arith.constant 0 : i32
    %c0_i32_1 = arith.constant 0 : i32
    return %arg1, %c0_i32, %c0_i32_0 : i32, i32, i32
  }
  func.func @transform_5(%arg0: i32, %arg1: i32) -> (i32, i32, i32) {
    %c0_i32 = arith.constant 0 : i32
    %c0_i32_0 = arith.constant 0 : i32
    %c0_i32_1 = arith.constant 0 : i32
    return %arg1, %c0_i32, %c0_i32_0 : i32, i32, i32
  }
  func.func @transform_6(%arg0: i32, %arg1: i32) -> (i32, i32, i32) {
    %c0_i32 = arith.constant 0 : i32
    %c0_i32_0 = arith.constant 0 : i32
    %c0_i32_1 = arith.constant 0 : i32
    return %arg1, %c0_i32, %c0_i32_0 : i32, i32, i32
  }
  func.func @transform_7(%arg0: i32, %arg1: i32) -> (i32, i32, i32) {
    %c0_i32 = arith.constant 0 : i32
    %c0_i32_0 = arith.constant 0 : i32
    %c0_i32_1 = arith.constant 0 : i32
    return %arg1, %c0_i32, %c0_i32_0 : i32, i32, i32
  }
  func.func @transform_8(%arg0: i32, %arg1: i32) -> (i32, i32, i32) {
    %c0_i32 = arith.constant 0 : i32
    %c0_i32_0 = arith.constant 0 : i32
    %c0_i32_1 = arith.constant 0 : i32
    return %arg1, %c0_i32, %c0_i32_0 : i32, i32, i32
  }
  func.func @transform_9(%arg0: i32, %arg1: i32) -> (i32, i32, i32) {
    %c0_i32 = arith.constant 0 : i32
    %c0_i32_0 = arith.constant 0 : i32
    %c0_i32_1 = arith.constant 0 : i32
    return %arg1, %c0_i32, %c0_i32_0 : i32, i32, i32
  }
  func.func @transform_10(%arg0: i32, %arg1: i32) -> (i32, i32, i32) {
    %c0_i32 = arith.constant 0 : i32
    %c0_i32_0 = arith.constant 0 : i32
    %c0_i32_1 = arith.constant 0 : i32
    return %arg1, %c0_i32, %c0_i32_0 : i32, i32, i32
  }
  func.func @transform_11(%arg0: i32, %arg1: i32) -> (i32, i32, i32) {
    %c0_i32 = arith.constant 0 : i32
    %c0_i32_0 = arith.constant 0 : i32
    %c0_i32_1 = arith.constant 0 : i32
    return %arg1, %c0_i32, %c0_i32_0 : i32, i32, i32
  }
  func.func @transform_12(%arg0: i32, %arg1: i32) -> (i32, i32, i32) {
    %c0_i32 = arith.constant 0 : i32
    %c0_i32_0 = arith.constant 0 : i32
    %c0_i32_1 = arith.constant 0 : i32
    return %arg1, %c0_i32, %c0_i32_0 : i32, i32, i32
  }
  func.func @transform_13(%arg0: i32, %arg1: i32) -> (i32, i32, i32) {
    %c0_i32 = arith.constant 0 : i32
    %c0_i32_0 = arith.constant 0 : i32
    %c0_i32_1 = arith.constant 0 : i32
    return %arg1, %c0_i32, %c0_i32_0 : i32, i32, i32
  }
  func.func @transform_14(%arg0: i32, %arg1: i32) -> (i32, i32, i32) {
    %c0_i32 = arith.constant 0 : i32
    %c0_i32_0 = arith.constant 0 : i32
    %c0_i32_1 = arith.constant 0 : i32
    return %arg1, %c0_i32, %c0_i32_0 : i32, i32, i32
  }
  func.func @transform_15(%arg0: i32, %arg1: i32) -> (i32, i32) {
    %c0_i32 = arith.constant 0 : i32
    %c0_i32_0 = arith.constant 0 : i32
    %c0_i32_1 = arith.constant 0 : i32
    return %c0_i32, %c0_i32_0 : i32, i32
  }
  func.func @transform_16(%arg0: i32, %arg1: i32) -> (i32, i32) {
    %c0_i32 = arith.constant 0 : i32
    %c0_i32_0 = arith.constant 0 : i32
    %c0_i32_1 = arith.constant 0 : i32
    return %c0_i32, %c0_i32_0 : i32, i32
  }
  func.func @transform_17(%arg0: i32, %arg1: i32) -> (i32, i32) {
    %c0_i32 = arith.constant 0 : i32
    %c0_i32_0 = arith.constant 0 : i32
    %c0_i32_1 = arith.constant 0 : i32
    return %c0_i32, %c0_i32_0 : i32, i32
  }
  func.func @transform_18(%arg0: i32, %arg1: i32) -> (i32, i32) {
    %c0_i32 = arith.constant 0 : i32
    %c0_i32_0 = arith.constant 0 : i32
    %c0_i32_1 = arith.constant 0 : i32
    return %c0_i32, %c0_i32_0 : i32, i32
  }
  func.func @transform_19(%arg0: i32, %arg1: i32) -> (i32, i32, i32) {
    %c0_i32 = arith.constant 0 : i32
    %c0_i32_0 = arith.constant 0 : i32
    %c0_i32_1 = arith.constant 0 : i32
    return %arg0, %c0_i32, %c0_i32_0 : i32, i32, i32
  }
}

</mosaic_0001>

<bundles_post_ra>
// kernel: tpu_custom_call.1
= control target key start
LH: loop header
LB: loop body
LE: loop exit
PB: predicated region body
PF: predicated region fallthrough
CT: control target
= control target key end

     0   :  { %s3297_s0 = inlined_call_operand.vmem [shape: f32[2,8,32], index: 0, kind: input, shape index: {}]   ;;  %s3298_s1 = inlined_call_operand.vmem [shape: f32[2,1,8], index: 1, kind: input, shape index: {}]   ;;  %s3299_s2 = inlined_call_operand.vmem [shape: f32[2,1,8], index: 2, kind: input, shape index: {}]   ;;  %s3300_s3 = inlined_call_operand.vmem [shape: bf16[2,32,96], index: 3, kind: input, shape index: {}]   ;;  %s3301_s4 = inlined_call_operand.vmem [shape: f32[2,1,96], index: 4, kind: input, shape index: {}]   ;;  %s3302_s5 = inlined_call_operand.vmem [shape: bf16[2,32,32], index: 5, kind: input, shape index: {}]   ;;  %s3303_s6 = inlined_call_operand.vmem [shape: f32[2,1,32], index: 6, kind: input, shape index: {}]   ;;  %s3304_s7 = inlined_call_operand.hbm [shape: f32[2,1,32], index: 7, kind: input, shape index: {}]   ;;  %s3305_s8 = inlined_call_operand.hbm [shape: f32[2,1,32], index: 8, kind: input, shape index: {}]   ;;  %s3306_s9 = inlined_call_operand.vmem [shape: bf16[2,32,64], index: 9, kind: input, shape index: {}]   ;;  %s3307_s10 = inlined_call_operand.hbm [shape: f32[2,1,64], index: 10, kind: input, shape index: {}]   ;;  %s3308_s11 = inlined_call_operand.vmem [shape: bf16[2,64,32], index: 11, kind: input, shape index: {}]   ;;  %s3309_s12 = inlined_call_operand.vmem [shape: f32[2,1,32], index: 12, kind: input, shape index: {}]   ;;  %s3310_s13 = inlined_call_operand.vmem [shape: f32[2,1,32], index: 13, kind: input, shape index: {}]   ;;  %s3311_s14 = inlined_call_operand.vmem [shape: f32[2,1,32], index: 14, kind: input, shape index: {}]   ;;  %s3312_s15 = inlined_call_operand.vmem [shape: f32[1,32], index: 15, kind: input, shape index: {}]   ;;  %s3313_s16 = inlined_call_operand.vmem [shape: f32[1,32], index: 16, kind: input, shape index: {}]   ;;  %s3314_s17 = inlined_call_operand.vmem [shape: bf16[32,16], index: 17, kind: input, shape index: {}]   ;;  %s3315_s18 = inlined_call_operand.vmem [shape: f32[1,16], index: 18, kind: input, shape index: {}]   ;;  %s3316_s19 = inlined_call_operand.hbm [shape: f32[2,1,16], index: 19, kind: output, shape index: {}]  }
   0x1   :  { %3336 = sst [smem:[#allocation27_spill]] %s3297_s0 }
   0x2   :  { %3337 = sst [smem:[#allocation28_spill]] %s3298_s1 }
   0x3   :  { %3338 = sst [smem:[#allocation29_spill]] %s3299_s2 }
   0x4   :  { %3339 = sst [smem:[#allocation30_spill]] %s3300_s3 }
   0x5   :  { %3340 = sst [smem:[#allocation31_spill]] %s3302_s5 }
   0x6   :  { %3341 = sst [smem:[#allocation32_spill]] %s3304_s7 }
   0x7   :  { %3342 = sst [smem:[#allocation33_spill]] %s3305_s8 }
   0x8   :  { %3343 = sst [smem:[#allocation34_spill]] %s3306_s9 }
   0x9   :  { %3344 = sst [smem:[#allocation35_spill]] %s3307_s10 }
   0xa   :  { %3345 = sst [smem:[#allocation36_spill]] %s3308_s11 }
   0xb   :  { %3346 = sst [smem:[#allocation37_spill]] %s3309_s12 }
   0xc   :  { %3347 = sst [smem:[#allocation38_spill]] %s3310_s13 }
   0xd   :  { %3348 = sst [smem:[#allocation39_spill]] %s3311_s14 }
   0xe   :  { %3349 = sst [smem:[#allocation40_spill]] %s3312_s15 }
   0xf   :  { %3350 = sst [smem:[#allocation41_spill]] %s3313_s16 }
  0x10   :  { %3351 = sst [smem:[#allocation42_spill]] %s3314_s17 }
  0x11   :  { %3352 = sst [smem:[#allocation43_spill]] %s3315_s18 }
  0x12   :  { %3353 = sst [smem:[#allocation44_spill]] %s3316_s19 }
  0x13   :  { %24 = vsyncpa [#allocation4], 0 }
  0x14   :  { %26 = vsyncpa [#allocation4 + $0x1], 0 }
  0x15   :  { %27 = vsyncpa [#allocation7], 0 }
  0x16   :  { %29 = vsyncpa [#allocation7 + $0x1], 0 }
  0x17   :  { %30 = vsyncpa [#allocation5], 0 }
  0x18   :  { %32 = vsyncpa [#allocation5 + $0x1], 0  ;;  %s2765_s0 = smov 0   ;;  %s2767_s30 = smov 0  }
  0x19   :  { %s2769_s20 = smov 0   ;;  %s2771_s21 = smov 0  }
  0x1a   :  { %s2773_s1 = smov 0   ;;  %s2775_s22 = smov 0  }
  0x1b   :  { %s2777_s2 = smov 0   ;;  %s2779_s23 = smov 0  }
  0x1c   :  { %s2781_s24 = smov 0   ;;  %s2783_s25 = smov 0  }
  0x1d   :  { %s2785_s3 = smov 0  }
  0x1e LB: > { %3354 = sst [smem:[#allocation13_spill]] %s2601_s0  ;;  %s2819_s26 = sadd.s32 4294967295, %s2641_s3   ;;  %s2641_s3 = sphi %s2785_s3, %s38_s3   ;;  %s2637_s25 = sphi %s2783_s25, %s3426_s25   ;;  %s2633_s24 = sphi %s2781_s24, %s3425_s24   ;;  %s2629_s23 = sphi %s2779_s23, %s3424_s23   ;;  %s2625_s2 = sphi %s2777_s2, %s3423_s2   ;;  %s2621_s22 = sphi %s2775_s22, %s3422_s22   ;;  %s2617_s1 = sphi %s2773_s1, %s3421_s1   ;;  %s2613_s21 = sphi %s2771_s21, %s3420_s21   ;;  %s2609_s20 = sphi %s2769_s20, %s3419_s20   ;;  %s2605_s30 = sphi %s2767_s30, %s3428_s30   ;;  %s2601_s0 = sphi %s2765_s0, %s3427_s0  }
  0x1f   : > { %3355 = sst [smem:[#allocation14_spill]] %s2609_s20  ;;  %s2074_s27 = sadd.s32 4294967294, %s2641_s3  }
  0x20   : > { %3356 = sst [smem:[#allocation15_spill]] %s2617_s1  ;;  %s47_s28 = sadd.s32 1, %s2633_s24 }
  0x21   : > { %3357 = sst [smem:[#allocation16_spill]] %s2621_s22  ;;  %s50_s29 = sadd.s32 1, %s2637_s25 }
  0x22   : > { %3358 = sst [smem:[#allocation17_spill]] %s2629_s23  ;;  %p48_p0 = scmp.ge.s32.totalorder %s47_s28, 2 }
  0x23   : > { %3359 = sst [smem:[#allocation18_spill]] %s2633_s24  ;;  %s239_s19 = sadd.s32 1, %s2621_s22 }
  0x24   : > { %3360 = sst [smem:[#allocation19_spill]] %s2637_s25  ;;  %p246_p1 = scmp.ne.s32.totalorder %s2621_s22, %s2617_s1 }
  0x25   : > { %3361 = sst [smem:[#allocation20_spill]] %s2641_s3  ;;  %p247_p2 = scmp.eq.s32.totalorder %s2641_s3, 0 }
  0x26   : > { %s3430_s28 = smov (%p48_p0, %s47_s28), 0  ;;  %s3432_s29 = smov (!%p48_p0, %s50_s29), %s2637_s25 }
  0x27   : > { %3362 = sst [smem:[#allocation21_spill]] %s3430_s28  ;;  %s236_s18 = ssub.s32 %s2633_s24, %s3430_s28 }
  0x28   : > { %p2833_p3 = por %p247_p2, %p246_p1  ;;  %p52_p4 = scmp.ge.s32.totalorder %s3432_s29, 2 }
  0x29   : > { %p237_p5 = scmp.eq.s32.totalorder %s236_s18, 0  ;;  %p252_p6 = scmp.ne.s32.totalorder %s2617_s1, %s2613_s21 }
  0x2a   : > { %p253_p7 = scmp.eq.s32.totalorder %s2819_s26, 0  ;;  %s3434_s29 = smov (%p52_p4, %s3432_s29), 0 }
  0x2b   : > { %3364 = sst [smem:[#allocation22_spill]] %s3434_s29  ;;  %s528_s17 = ssub.s32 %s2637_s25, %s3434_s29 }
  0x2c   : > { %s2842_s15 = scalar_select %p237_p5, %s2621_s22, %s239_s19  }
  0x2d   : > { %p2844_p8 = por %p253_p7, %p252_p6  ;;  %p529_p9 = scmp.eq.s32.totalorder %s528_s17, 0 }
  0x2e   : > { %3365 = sst [smem:[#allocation23_spill]] %s2842_s15  ;;  %s531_s14 = sadd.s32 1, %s2609_s20 }
  0x2f   : > { %s3366_s28 = scalar_select %p2844_p8, 1, 0 }
  0x30   : > { %p541_p10 = scmp.ne.s32.totalorder %s2609_s20, %s2605_s30  ;;  %p542_p11 = scmp.eq.s32.totalorder %s2819_s26, 3 }
  0x31   : > { %s2855_s18 = scalar_select %p529_p9, %s2609_s20, %s531_s14  }
  0x32   : > { %p2857_p12 = por %p542_p11, %p541_p10  ;;  %p547_p13 = scmp.ne.s32.totalorder %s2605_s30, %s2601_s0 }
  0x33   : > { %3367 = sst [smem:[#allocation24_spill]] %s2855_s18  ;;  %p548_p0 = scmp.eq.s32.totalorder %s2074_s27, 3 }
  0x34   : > { %s3368_s21 = scalar_select %p2857_p12, 1, 0 }
  0x35   : > { %p2281_p1 = scmp.lt.s32.totalorder %s2641_s3, 4  ;;  %s2865_s19 = sand.u32 1, %s2621_s22  }
  0x36   : > { %3369 = sst [smem:[#allocation25_spill]] %s3368_s21  ;;  %p2867_p2 = por %p548_p0, %p547_p13 }
  0x37   : > { %s2872_s17 = sshll.u32 %s2633_s24, 4  ;;  %p2876_p4 = pnand %p2281_p1, %p2833_p3 }
  0x38   : > { %s3370_s29 = scalar_select %p2867_p2, 1, 0 }
  0x39   : > { %s3372_s14 = scalar_select %p2876_p4, 1, 0 }
  0x3a   : > { %3371 = sst [smem:[#allocation26_spill]] %s3370_s29  ;;  %s644_s25 = sand.u32 1, %s2641_s3  }
  0x3b   : > { %s3373_s8 = sld [smem:[#allocation33_spill]]  ;;  %s647_s18 = scalar_lea.vmem [#allocation6], %s2865_s19 }
  0x3c   : > { %s654_s24 = sshll.u32 %s647_s18, 4  ;;  %s2892_s16 = scalar_lea.sflag [#allocation7], %s644_s25  ;;  %s2889_s24 = int_to_ptr.vmem [resolvable:$true] %s654_s24 }
  0x3d   : > { %p2898_p7 = pneg %p2876_p4 }
  0x41   : > { %s2885_s22 = scalar_lea.hbm %s3373_s8, %s2872_s17  ;;  %s2430_s18 = scalar_lea.hbm %s3373_s8, 32 }
  0x42   : > { %s2425_s20 = scalar_lea.hbm %s2885_s22, 16  ;;  %p2431_p11 = scmp.lt.u32.totalorder %s2885_s22, %s3373_s8 }
  0x43   : > { %p2426_p6 = scmp.ne.s32.totalorder %s2885_s22, %s2425_s20  ;;  %p2432_p13 = scmp.lt.u32.totalorder %s2430_s18, %s2425_s20 }
  0x44   : > { %p2434_p1 = scmp.lt.u32.totalorder %s2425_s20, %s2885_s22 }
  0x45   : > { %p2428_p9 = pnand %p2898_p7, %p2426_p6  ;;  %p2433_p0 = por %p2432_p13, %p2431_p11 }
  0x47   : > { %p2429_p10 = pneg %p2428_p9  ;;  %p2435_p5 = por %p2434_p1, %p2433_p0 }
  0x49   : > { %p2436_p3 = pnand %p2435_p5, %p2429_p10 }
  0x4b   : > { %2439 = shalt.err (!%p2436_p3)
}
  0x4c   : > { %s2440_s25 = scalar_lea.vmem %s2889_s24, 16  ;;  %s2643_s15 = smov [#allocation6]  }
  0x4d   : > { %p2441_p6 = scmp.ne.s32.totalorder %s2889_s24, %s2440_s25  ;;  %s2445_s27 = sshll.u32 %s2643_s15, 4  ;;  %s2446_s27 = int_to_ptr.vmem [resolvable:$false] %s2445_s27 }
  0x4e   : > { %s2447_s0 = scalar_lea.vmem %s2446_s27, 32  ;;  %p2448_p12 = scmp.lt.s32.totalorder %s2889_s24, %s2446_s27 }
  0x4f   : > { %p2443_p9 = pnand %p2441_p6, %p2898_p7  ;;  %p2449_p8 = scmp.lt.s32.totalorder %s2447_s0, %s2440_s25 }
  0x51   : > { %p2444_p2 = pneg %p2443_p9  ;;  %p2450_p11 = por %p2449_p8, %p2448_p12 }
  0x53   : > { %p2451_p13 = pnand %p2450_p11, %p2444_p2 }
  0x55   : > { %2454 = shalt.err (!%p2451_p13)
}
  0x56   : > { %2273 = dma.hbm_to_vmem [thread:$0]  (!%p2876_p4), %s2885_s22, 16, %s2889_s24, %s2892_s16  }
  0x57   : > { %p3375_p5 = scmp.lt.s32.totalorder %s2641_s3, 5  ;;  %p3376_p3 = scmp.ge.s32.totalorder %s2641_s3, 1 }
  0x58   : > { %s3378_s7 = sld [smem:[#allocation32_spill]]  ;;  %s630_s15 = scalar_lea.vmem [#allocation3], %s2865_s19 }
  0x59   : > { %p2926_p10 = pnand %p3376_p3, %p3375_p5  ;;  %s637_s27 = sshll.u32 %s630_s15, 4  ;;  %s2937_s27 = int_to_ptr.vmem [resolvable:$true] %s637_s27 }
  0x5a   : > { %s3379_s10 = sld [smem:[#allocation35_spill]]  ;;  %s628_s8 = scalar_lea.sflag [#allocation4], %s2865_s19 }
  0x5b   : > { %s3377_s20 = scalar_select %p2926_p10, 1, 0 }
  0x5e   : > { %s2934_s25 = scalar_lea.hbm %s3378_s7, %s2872_s17  ;;  %s2460_s13 = scalar_lea.hbm %s3378_s7, 32 }
  0x5f   : > { %s2455_s3 = scalar_lea.hbm %s2934_s25, 16  ;;  %p2461_p0 = scmp.lt.u32.totalorder %s2934_s25, %s3378_s7 }
  0x60   : > { %s2943_s0 = scalar_lea.hbm %s3379_s10, %s2872_s17  ;;  %p2456_p8 = scmp.ne.s32.totalorder %s2934_s25, %s2455_s3 }
  0x61   : > { %p2462_p1 = scmp.lt.u32.totalorder %s2460_s13, %s2455_s3  ;;  %p2464_p9 = scmp.lt.u32.totalorder %s2455_s3, %s2934_s25 }
  0x62   : > { %p2458_p12 = pnand %p2456_p8, %p2898_p7 }
  0x63   : > { %p2463_p6 = por %p2462_p1, %p2461_p0 }
  0x64   : > { %p2459_p2 = pneg %p2458_p12 }
  0x65   : > { %p2465_p11 = por %p2464_p9, %p2463_p6 }
  0x67   : > { %p2466_p13 = pnand %p2465_p11, %p2459_p2 }
  0x69   : > { %2469 = shalt.err (!%p2466_p13)
}
  0x6a   : > { %s2470_s17 = scalar_lea.vmem %s2937_s27, 16  ;;  %s2644_s15 = smov [#allocation3]  }
  0x6b   : > { %p2471_p5 = scmp.ne.s32.totalorder %s2937_s27, %s2470_s17  ;;  %s2475_s22 = sshll.u32 %s2644_s15, 4  ;;  %s2476_s22 = int_to_ptr.vmem [resolvable:$false] %s2475_s22 }
  0x6c   : > { %s2477_s11 = scalar_lea.vmem %s2476_s22, 32  ;;  %p2478_p12 = scmp.lt.s32.totalorder %s2937_s27, %s2476_s22 }
  0x6d   : > { %p2473_p3 = pnand %p2471_p5, %p2898_p7  ;;  %p2479_p10 = scmp.lt.s32.totalorder %s2477_s11, %s2470_s17 }
  0x6f   : > { %p2474_p8 = pneg %p2473_p3  ;;  %p2480_p0 = por %p2479_p10, %p2478_p12 }
  0x71   : > { %p2481_p1 = pnand %p2480_p0, %p2474_p8 }
  0x73   : > { %2484 = shalt.err (!%p2481_p1)
}
  0x74   : > { %2270 = dma.hbm_to_vmem [thread:$0]  (!%p2876_p4), %s2934_s25, 16, %s2937_s27, %s628_s8  }
  0x75   : > { %s672_s12 = scalar_lea.vmem [#allocation8], %s2865_s19  ;;  %s2485_s3 = scalar_lea.hbm %s2943_s0, 16 }
  0x76   : > { %s679_s13 = sshll.u32 %s672_s12, 4  ;;  %p2486_p2 = scmp.ne.s32.totalorder %s2943_s0, %s2485_s3  ;;  %s680_s13 = int_to_ptr.vmem [resolvable:$true] %s679_s13 }
  0x77   : > { %s2490_s18 = scalar_lea.hbm %s3379_s10, 32  ;;  %p2491_p9 = scmp.lt.u32.totalorder %s2943_s0, %s3379_s10 }
  0x78   : > { %p2488_p10 = pnand %p2486_p2, %p2898_p7  ;;  %p2492_p11 = scmp.lt.u32.totalorder %s2490_s18, %s2485_s3 }
  0x79   : > { %p2494_p5 = scmp.lt.u32.totalorder %s2485_s3, %s2943_s0 }
  0x7a   : > { %p2489_p6 = pneg %p2488_p10  ;;  %p2493_p13 = por %p2492_p11, %p2491_p9 }
  0x7c   : > { %p2495_p3 = por %p2494_p5, %p2493_p13 }
  0x7e   : > { %p2496_p8 = pnand %p2495_p3, %p2489_p6 }
  0x80   : > { %2499 = shalt.err (!%p2496_p8)
}
  0x81   : > { %s2500_s8 = scalar_lea.vmem %s680_s13, 16  ;;  %s2645_s19 = smov [#allocation8]  }
  0x82   : > { %p2501_p12 = scmp.ne.s32.totalorder %s680_s13, %s2500_s8  ;;  %s2505_s25 = sshll.u32 %s2645_s19, 4  ;;  %s2506_s25 = int_to_ptr.vmem [resolvable:$false] %s2505_s25 }
  0x83   : > { %s2507_s27 = scalar_lea.vmem %s2506_s25, 32  ;;  %p2508_p2 = scmp.lt.s32.totalorder %s680_s13, %s2506_s25 }
  0x84   : > { %p2503_p0 = pnand %p2501_p12, %p2898_p7  ;;  %p2509_p10 = scmp.lt.s32.totalorder %s2507_s27, %s2500_s8 }
  0x86   : > { %p2504_p1 = pneg %p2503_p0  ;;  %p2510_p4 = por %p2509_p10, %p2508_p2 }
  0x88   : > { %p2511_p9 = pnand %p2510_p4, %p2504_p1 }
  0x8a   : > { %2514 = shalt.err (!%p2511_p9)
}
  0x8b   : > { %p3380_p11 = scmp.ne.s32.totalorder %s3372_s14, 0  ;;  %p3381_p6 = scmp.ne.s32.totalorder %s3377_s20, 0 }
  0x8c   : > { %s2989_s29 = sand.u32 (!%p3381_p6), 1, %s2617_s1   ;;  %p3382_p7 = scmp.ne.s32.totalorder (!%p3381_p6), %s3366_s28, 0 }
  0x8d   : > { %2276 = dma.hbm_to_vmem [thread:$0]  (!%p3380_p11), %s2943_s0, 16, %s680_s13, %s2892_s16  }
  0x8e   : > { %714 = sbr.rel (%p3381_p6) target bundleno = 3321 (0xcf9), region = 96  ;;  %s717_s22 = scalar_lea.sflag (!%p3381_p6), [#allocation4], %s2989_s29 }
  0x95   : > { %2588 = dma.done.wait (%p3382_p7), %s717_s22, 16  }
  0x96   : > { %2590 = vsyncadd (%p3382_p7), %s717_s22, 4294967280  ;;  %s724_s14 = sand.u32 1, %s2819_s26  }
  0x97   : > { %s725_s16 = scalar_lea.sflag [#allocation7], %s724_s14 }
  0x98   : > { %2592 = dma.done.wait (%p3382_p7), %s725_s16, 32  }
  0x99   : > { %2594 = vsyncadd (%p3382_p7), %s725_s16, 4294967264  ;;  %p841_p4 = scmp.lt.s32.totalorder %s2629_s23, 1  ;;  %p851_p13 = scmp.lt.s32.totalorder %s2625_s2, 1 }
  0x9a   : > { %s3384_s15 = sld [smem:[#allocation27_spill]]  ;;  %s3386_s10 = sld [smem:[#allocation30_spill]] }
  0x9b   : > { %s3007_s12 = scalar_select %p841_p4, %s2629_s23, 1 }
  0x9c   : > { %s3010_s26 = scalar_select %p851_p13, %s2625_s2, 1 }
  0x9d   : > { %s2081_s28 = sshll.u32 %s3007_s12, 3  ;;  %s3387_s5 = sld [smem:[#allocation31_spill]] }
  0x9e   : > { %s2130_s14 = sshll.u32 %s3010_s26, 4  ;;  %s3388_s9 = sld [smem:[#allocation34_spill]] }
  0x9f   : > { %s2133_s20 = sshll.u32 %s3010_s26, 5  ;;  %s3389_s22 = sld [smem:[#allocation37_spill]] }
  0xa0   : > { %s844_s8 = scalar_lea.vmem %s3384_s15, %s2081_s28  ;;  %s855_s1 = scalar_lea.vmem %s3386_s10, %s2130_s14 }
  0xa1   : > { %s3390_s21 = sld [smem:[#allocation36_spill]]  ;;  %s3392_s23 = sld [smem:[#allocation39_spill]] }
  0xa2   : > { %s3393_s19 = sand.u32 1, %s2605_s30   ;;  %p2090_p5 = scmp.ne.s32.totalorder %s2625_s2, 0 }
  0xa3   : > { %s3035_s24 = scalar_lea.vmem %s3387_s5, %s2130_s14  ;;  %s3391_s5 = sld [smem:[#allocation38_spill]]  ;;  %v891_v0 = vld [vmem:[%s844_s8] sm:$0xff] (!%p2090_p5)  ;;  %vm892_vm0 = vcmask (!%p2090_p5), 261120  }
  0xa4   : > { %s3044_s25 = scalar_lea.vmem %s3388_s9, %s2130_s14  ;;  %s735_s14 = scalar_lea.vmem [#allocation8], %s2989_s29  ;;  %893 = vst.msk [vmem:[#allocation2] sm:$0xff] (!%p2090_p5), %vm892_vm0, %v891_v0 }
  0xa5   : > { %s879_s7 = scalar_lea.vmem %s3389_s22, %s3010_s26  ;;  %s3067_s9 = scalar_lea.vmem [#allocation9], %s3393_s19 }
  0xa6   : > { %890 = sbr.rel (%p2090_p5) target bundleno = 173 (0xad), region = 112 }
  0xa7   : > { %s3054_s13 = scalar_lea.vmem %s3390_s21, %s2133_s20  ;;  %s885_s15 = scalar_lea.vmem %s3392_s23, %s3010_s26 }
  0xa9   : > { %s882_s18 = scalar_lea.vmem %s3391_s5, %s3010_s26 }
  0xad PF: > { %v2389_v1 = vld [vmem:[%s855_s1] sm:$0xff]   ;;  %v2646_v2 = vmov 0.0   ;;  %v2390_v3 = vld [vmem:[%s855_s1 + $0x8] sm:$0xff]   ;;  %vm2647_vm1 = vmmov 0   ;;  %vm919_vm2 = vcmask 261120   ;;  %s3394_s23 = scalar_lea.vmem %s3301_s4, %s3010_s26  ;;  %s2648_s11 = smov 120  }
  0xae   : > { %2167 = vmatprep.subr.bf16.mxu0 %v2646_v2  ;;  %2175 = vmatprep.subr.bf16.mxu1 %v2646_v2  ;;  %v3074_v4 = vld [vmem:[#allocation2] sm:$0xff]  ;;  %s2649_s21 = smov 96   ;;  %s2650_s8 = smov 80   ;;  %vm968_vm3 = vcmask 64512   ;;  %vm1040_vm4 = vcmask 1043456   ;;  %vm1433_vm5 = vcmask 130048  }
  0xaf   : > { %2168 = vmatpush3.bf16.msra.mxu0 %v2389_v1  ;;  %2171 = vmatprep.mubr.msk.bf16.mxu0 %vm2647_vm1, %v2646_v2  ;;  %v895_v5 = vpack.c.bf16 %v3074_v4, %v3074_v4  ;;  %v2091_v6 = vld [vmem:[%s3394_s23] ss:$0 sm:$0xff]  ;;  %s2651_s22 = smov 88   ;;  %s2652_s17 = smov 72   ;;  %vm1435_vm6 = vcmask 195584   ;;  %vm1651_vm7 = vcmask 523264  }
  0xb0   : > { %2169 = vmatprep.subr.bf16.mxu0 %v2646_v2  ;;  %2177 = vmatprep.mubr.msk.bf16.mxu1 %vm2647_vm1, %v2646_v2  ;;  %s2653_s20 = smov 112   ;;  %s2654_s27 = smov 104  }
  0xb1   : > { %s3395_s0 = sld [smem:[#allocation28_spill]]  ;;  %s2655_s28 = smov 56  }
  0xb2   : > { %s2656_s19 = smov 64   ;;  %s2657_s5 = smov 40  }
  0xb3   : > { %2170 = vmatpush3.bf16.msra.mxu0 %v2390_v3  ;;  %s2658_s1 = smov 48   ;;  %s2659_s23 = smov 8  }
  0xb4   : > { %2181 = vmatprep.subr.bf16.mxu0 %v2646_v2  ;;  %p2122_p3 = scmp.ne.s32.totalorder %s2625_s2, 1 }
  0xb5   : > { %vm2663_vm8 = vmmov (!%p2122_p3), 0   ;;  %vm1824_vm9 = vcmask (!%p2122_p3), 122880  }
  0xb6   : > { %2172 = vmatmul.mubr.msk.bf16.vlgmr.msra.gmra.mrb[0].mxu0 %vm919_vm2, %v895_v5 }
  0xb7   : > { %2183 = vmatprep.mubr.msk.bf16.mxu0 %vm2647_vm1, %v2646_v2  ;;  %s3396_s3 = scalar_lea.vmem %s3395_s0, %s3007_s12 }
  0xb8   : > { %v2096_v25 = vld [vmem:[%s3396_s3] ss:$0 sm:$0xff] }
 0x189   : > { %v957_v7 = vpop.f32.mrb[0].mxu0 }
 0x18a   : > { %v958_v8 = vadd.f32 %v2091_v6, %v957_v7  ;;  %v2173_v9 = vpop.f32.mrb[1].mxu0 }
 0x18b   : > { %v960_v10 = vpop.f32.mrb[2].mxu0 }
 0x18c   : > { %v3090_v11 = vpack.c.bf16 %v958_v8, %v958_v8  ;;  %v2174_v12 = vpop.f32.mrb[3].mxu0 }
 0x18e   : > { %1084 = vrot.lane.b32.xlu1 %v3090_v11, %s2648_s11  ;;  %966 = vrot.lane.b32.xlu0 %v3090_v11, %s2649_s21  ;;  %s2660_s11 = smov 16   ;;  %s2661_s21 = smov 24  }
 0x192   : > { %1198 = vrot.lane.b32.xlu1 %v3090_v11, %s2650_s8  ;;  %1086 = vrot.lane.b32.xlu0 %v3090_v11, %s2651_s22  ;;  %s3397_s22 = scalar_lea.vmem %s3303_s6, %s3010_s26  ;;  %s3405_s26 = sld [smem:[#allocation42_spill]] (!%p2122_p3) }
 0x193   : > { %s3407_s8 = sld [smem:[#allocation41_spill]] (!%p2122_p3) }
 0x196   : > { %1310 = vrot.lane.b32.xlu1 %v3090_v11, %s2652_s17  ;;  %1196 = vrot.lane.b32.xlu0 %v3090_v11, %s2653_s20  ;;  %s3398_s17 = scalar_lea.vmem [#allocation3], %s2989_s29  ;;  %s3399_s20 = scalar_lea.vmem [#allocation6], %s2989_s29 }
 0x19a   : > { %1308 = vrot.lane.b32.xlu0 %v3090_v11, %s2654_s27 }
 0x200   : > { %v967_v13 = vpop.permute.xlu0 %966  ;;  %v1085_v16 = vpop.permute.xlu1 %1084 }
 0x201   : > { %v973_v14 = vsel %vm968_vm3, %v967_v13, 0 }
 0x202   : > { %2176 = vmatpush3.bf16.xpose.msra.mxu1 %v973_v14 }
 0x203   : > { %2187 = vmatprep.subr.bf16.mxu1 %v2646_v2 }
 0x204   : > { %v1087_v15 = vpop.permute.xlu0 %1086  ;;  %v1199_v18 = vpop.permute.xlu1 %1198 }
 0x205   : > { %v1092_v17 = vsel %vm968_vm3, %v1087_v15, 0  ;;  %v1204_v19 = vsel %vm968_vm3, %v1199_v18, 0 }
 0x208   : > { %v1311_v20 = vpop.permute.xlu1 %1310  ;;  %v1197_v21 = vpop.permute.xlu0 %1196 }
 0x209   : > { %2178 = vmatmul.mubr.msk.bf16.vlgmr.msra.gmra.mrb[0].mxu1 %vm968_vm3, %v3090_v11  ;;  %v1316_v22 = vsel %vm968_vm3, %v1311_v20, 0 }
 0x20a   : > { %2188 = vmatpush3.bf16.xpose.msra.mxu1 %v1092_v17  ;;  %2189 = vmatprep.mubr.msk.bf16.mxu1 %vm2647_vm1, %v2646_v2 }
 0x20b   : > { %2199 = vmatprep.subr.bf16.mxu1 %v2646_v2 }
 0x20c   : > { %v1309_v23 = vpop.permute.xlu0 %1308 }
 0x211   : > { %2190 = vmatmul.mubr.msk.bf16.vlgmr.msra.gmra.mrb[4].mxu1 %vm968_vm3, %v1085_v16 }
 0x212   : > { %2200 = vmatpush3.bf16.xpose.msra.mxu1 %v1204_v19  ;;  %2201 = vmatprep.mubr.msk.bf16.mxu1 %vm2647_vm1, %v2646_v2 }
 0x213   : > { %2211 = vmatprep.subr.bf16.mxu1 %v2646_v2 }
 0x219   : > { %2202 = vmatmul.mubr.msk.bf16.vlgmr.msra.gmra.mrb[8].mxu1 %vm968_vm3, %v1197_v21 }
 0x21a   : > { %2212 = vmatpush3.bf16.xpose.msra.mxu1 %v1316_v22  ;;  %2213 = vmatprep.mubr.msk.bf16.mxu1 %vm2647_vm1, %v2646_v2 }
 0x21b   : > { %2223 = vmatprep.subr.bf16.mxu1 %v2646_v2 }
 0x221   : > { %2214 = vmatmul.mubr.msk.bf16.vlgmr.msra.gmra.mrb[12].mxu1 %vm968_vm3, %v1309_v23 }
 0x222   : > { %2227 = vmatprep.mubr.msk.bf16.mxu1 %vm2647_vm1, %v2646_v2 }
 0x2dc   : > { %v1009_v24 = vpop.f32.mrb[0].mxu1 }
 0x2dd   : > { %v1015_v26 = vmul.f32 0.35355338, %v1009_v24  ;;  %v2179_v27 = vpop.f32.mrb[1].mxu1 }
 0x2de   : > { %v1012_v28 = vpop.f32.mrb[2].mxu1 }
 0x2df   : > { %v2180_v29 = vpop.f32.mrb[3].mxu1  ;;  %v1022_v30 = vadd.f32 %v2096_v25, %v1015_v26 }
 0x2e1   : > { %v1023_v31 = vsel %vm968_vm3, %v1022_v30, -inf }
 0x2e2   : > { %1024 = vmax.xlane.f32.xlu1 %v1023_v31 }
 0x2e4   : > { %v1128_v32 = vpop.f32.mrb[4].mxu1 }
 0x2e5   : > { %v1134_v33 = vmul.f32 0.35355338, %v1128_v32  ;;  %v2191_v34 = vpop.f32.mrb[5].mxu1 }
 0x2e6   : > { %v1131_v35 = vpop.f32.mrb[6].mxu1 }
 0x2e7   : > { %v2192_v36 = vpop.f32.mrb[7].mxu1  ;;  %v1135_v37 = vadd.f32 %v2096_v25, %v1134_v33 }
 0x2e9   : > { %v1136_v38 = vsel %vm968_vm3, %v1135_v37, -inf }
 0x2ea   : > { %1137 = vmax.xlane.f32.xlu0 %v1136_v38 }
 0x2ec   : > { %v1240_v39 = vpop.f32.mrb[8].mxu1 }
 0x2ed   : > { %v1246_v40 = vmul.f32 0.35355338, %v1240_v39  ;;  %v2203_v41 = vpop.f32.mrb[9].mxu1 }
 0x2ee   : > { %v1243_v42 = vpop.f32.mrb[10].mxu1 }
 0x2ef   : > { %v2204_v43 = vpop.f32.mrb[11].mxu1  ;;  %v1247_v44 = vadd.f32 %v2096_v25, %v1246_v40 }
 0x2f0   : > { %v2391_v43 = vld [vmem:[%s3035_s24] sm:$0xff]  }
 0x2f1   : > { %v1248_v45 = vsel %vm968_vm3, %v1247_v44, -inf  ;;  %2224 = vmatpush3.bf16.msra.mxu1 %v2391_v43 }
 0x2f2   : > { %1249 = vmax.xlane.f32.xlu0 %v1248_v45  ;;  %2225 = vmatprep.subr.bf16.mxu1 %v2646_v2 }
 0x2f4   : > { %v1352_v46 = vpop.f32.mrb[12].mxu1 }
 0x2f5   : > { %v1358_v47 = vmul.f32 0.35355338, %v1352_v46  ;;  %v2215_v48 = vpop.f32.mrb[13].mxu1 }
 0x2f6   : > { %v1355_v49 = vpop.f32.mrb[14].mxu1 }
 0x2f7   : > { %v2216_v50 = vpop.f32.mrb[15].mxu1  ;;  %v1359_v51 = vadd.f32 %v2096_v25, %v1358_v47 }
 0x2f9   : > { %v1360_v52 = vsel %vm968_vm3, %v1359_v51, -inf }
 0x2fa   : > { %1361 = vmax.xlane.f32.xlu1 %v1360_v52 }
 0x36f   : > { %v1025_v53 = vpop.xlane.xlu1 %1024 }
 0x370   : > { %v1026_v54 = vsub.f32 %v1022_v30, %v1025_v53 }
 0x372   : > { %v1027_v55 = vmul.f32 1.442695, %v1026_v54 }
 0x374   : > { %2399 = vpow2.f32 %v1027_v55 }
 0x377   : > { %v1138_v56 = vpop.xlane.xlu0 %1137 }
 0x378   : > { %v1139_v57 = vsub.f32 %v1135_v37, %v1138_v56 }
 0x37a   : > { %v1140_v58 = vmul.f32 1.442695, %v1139_v57 }
 0x37c   : > { %2401 = vpow2.f32 %v1140_v58 }
 0x37e   : > { %v2400_v59 = vpop.eup %2399 }
 0x37f   : > { %v1250_v60 = vpop.xlane.xlu0 %1249  ;;  %v1029_v61 = vsel %vm968_vm3, %v2400_v59, 0.0 }
 0x380   : > { %v1251_v62 = vsub.f32 %v1247_v44, %v1250_v60  ;;  %1030 = vadd.xlane.f32.xlu0 %v1029_v61  ;;  %v2392_v44 = vld [vmem:[%s3035_s24 + $0x8] sm:$0xff]   ;;  %v2104_v60 = vld [vmem:[%s3397_s22] ss:$0 sm:$0xff] }
 0x381   : > { %2226 = vmatpush3.bf16.msra.mxu1 %v2392_v44 }
 0x382   : > { %v1252_v63 = vmul.f32 1.442695, %v1251_v62  ;;  %2239 = vmatprep.subr.bf16.mxu1 %v2646_v2 }
 0x384   : > { %2403 = vpow2.f32 %v1252_v63 }
 0x386   : > { %v2402_v0 = vpop.eup %2401 }
 0x387   : > { %v1142_v1 = vsel %vm968_vm3, %v2402_v0, 0.0  ;;  %v1362_v6 = vpop.xlane.xlu1 %1361 }
 0x388   : > { %1143 = vadd.xlane.f32.xlu1 %v1142_v1  ;;  %v1363_v7 = vsub.f32 %v1359_v51, %v1362_v6 }
 0x38a   : > { %v1364_v8 = vmul.f32 1.442695, %v1363_v7 }
 0x38c   : > { %2405 = vpow2.f32 %v1364_v8 }
 0x38e   : > { %v2404_v3 = vpop.eup %2403 }
 0x38f   : > { %v1254_v5 = vsel %vm968_vm3, %v2404_v3, 0.0 }
 0x390   : > { %1255 = vadd.xlane.f32.xlu0 %v1254_v5 }
 0x396   : > { %v2406_v9 = vpop.eup %2405 }
 0x397   : > { %v1366_v10 = vsel %vm968_vm3, %v2406_v9, 0.0 }
 0x399   : > { %1148 = vrot.lane.b32.xlu1 %v3090_v11, %s2655_s28 }
 0x3a6   : > { %1035 = vrot.lane.b32.xlu0 %v3090_v11, %s2656_s19  ;;  %s3403_s19 = sld [smem:[#allocation29_spill]] (!%p2122_p3) }
 0x3aa   : > { %1372 = vrot.lane.b32.xlu0 %v3090_v11, %s2657_s5 }
 0x3ac   : > { %s3404_s5 = scalar_lea.vmem (!%p2122_p3), %s3403_s19, %s3007_s12 }
 0x3bd   : > { %1367 = vadd.xlane.f32.xlu1 %v1366_v10 }
 0x3ce   : > { %1260 = vrot.lane.b32.xlu1 %v3090_v11, %s2658_s1 }
 0x40d   : > { %v1031_v12 = vpop.xlane.xlu0 %1030 }
 0x40e   : > { %2407 = vrcp.f32 %v1031_v12  ;;  %v2393_v12 = vld [vmem:[%s3044_s25] sm:$0xff]  }
 0x415   : > { %v1144_v13 = vpop.xlane.xlu1 %1143 }
 0x416   : > { %2409 = vrcp.f32 %v1144_v13  ;;  %v2394_v13 = vld [vmem:[%s3044_s25 + $0x8] sm:$0xff]  }
 0x418   : > { %v2408_v14 = vpop.eup %2407 }
 0x419   : > { %v1033_v16 = vmul.f32 %v2408_v14, %v2400_v59  ;;  %v1149_v19 = vpop.permute.xlu1 %1148 }
 0x41a   : > { %v1154_v22 = vsel %vm1040_vm4, %v1149_v19, 0  ;;  %v2109_v19 = vld [vmem:[%s3399_s20] ss:$0 sm:$0xff]  ;;  %s3408_s20 = sld [smem:[#allocation43_spill]] (!%p2122_p3) }
 0x41b   : > { %v1034_v20 = vpack.c.bf16 %v1033_v16, %v1033_v16 }
 0x41d   : > { %v1256_v15 = vpop.xlane.xlu0 %1255 }
 0x41e   : > { %2411 = vrcp.f32 %v1256_v15 }
 0x420   : > { %v2410_v21 = vpop.eup %2409 }
 0x421   : > { %v1036_v17 = vpop.permute.xlu0 %1035  ;;  %v1146_v11 = vmul.f32 %v2410_v21, %v2402_v0 }
 0x422   : > { %v1042_v18 = vsel %vm1040_vm4, %v1036_v17, 0  ;;  %v2108_v17 = vld [vmem:[%s3398_s17] ss:$0 sm:$0xff] }
 0x423   : > { %2182 = vmatpush3.bf16.msra.mxu0 %v1042_v18  ;;  %v1147_v23 = vpack.c.bf16 %v1146_v11, %v1146_v11  ;;  %v2395_v11 = vld [vmem:[%s3054_s13] sm:$0xff]  }
 0x424   : > { %2193 = vmatprep.subr.bf16.mxu0 %v2646_v2 }
 0x425   : > { %v1373_v29 = vpop.permute.xlu0 %1372 }
 0x426   : > { %2184 = vmatmul.mubr.msk.bf16.vlgmr.msra.gmra.mrb[4].mxu0 %vm968_vm3, %v1034_v20  ;;  %v1378_v31 = vsel %vm1040_vm4, %v1373_v29, 0 }
 0x427   : > { %2194 = vmatpush3.bf16.msra.mxu0 %v1154_v22  ;;  %2195 = vmatprep.mubr.msk.bf16.mxu0 %vm2647_vm1, %v2646_v2 }
 0x428   : > { %2205 = vmatprep.subr.bf16.mxu0 %v2646_v2  ;;  %v2412_v24 = vpop.eup %2411 }
 0x429   : > { %v1258_v26 = vmul.f32 %v2412_v24, %v2404_v3  ;;  %v2397_v24 = vld [vmem:[%s3054_s13 + $0x10] sm:$0xff]  }
 0x42b   : > { %v1259_v30 = vpack.c.bf16 %v1258_v26, %v1258_v26  ;;  %v2110_v26 = vld [vmem:[%s735_s14] ss:$0 sm:$0xff] }
 0x42e   : > { %2196 = vmatmul.mubr.msk.bf16.vlgmr.msra.gmra.mrb[8].mxu0 %vm968_vm3, %v1147_v23  ;;  %v2396_v23 = vld [vmem:[%s3054_s13 + $0x8] sm:$0xff]  }
 0x42f   : > { %2207 = vmatprep.mubr.msk.bf16.mxu0 %vm2647_vm1, %v2646_v2 }
 0x44a   : > { %v1368_v25 = vpop.xlane.xlu1 %1367 }
 0x44b   : > { %2413 = vrcp.f32 %v1368_v25  ;;  %v2398_v25 = vld [vmem:[%s3054_s13 + $0x18] sm:$0xff]  }
 0x44e   : > { %v1261_v27 = vpop.permute.xlu1 %1260 }
 0x44f   : > { %v1266_v28 = vsel %vm1040_vm4, %v1261_v27, 0 }
 0x450   : > { %2206 = vmatpush3.bf16.msra.mxu0 %v1266_v28 }
 0x451   : > { %2217 = vmatprep.subr.bf16.mxu0 %v2646_v2 }
 0x453   : > { %2208 = vmatmul.mubr.msk.bf16.vlgmr.msra.gmra.mrb[12].mxu0 %vm968_vm3, %v1259_v30 }
 0x454   : > { %2218 = vmatpush3.bf16.msra.mxu0 %v1378_v31  ;;  %2219 = vmatprep.mubr.msk.bf16.mxu0 %vm2647_vm1, %v2646_v2 }
 0x455   : > { %v2414_v32 = vpop.eup %2413  ;;  %2231 = vmatprep.subr.bf16.mxu0 %v2646_v2 }
 0x456   : > { %v1370_v33 = vmul.f32 %v2414_v32, %v2406_v9 }
 0x458   : > { %v1371_v34 = vpack.c.bf16 %v1370_v33, %v1370_v33 }
 0x45b   : > { %2220 = vmatmul.mubr.msk.bf16.vlgmr.msra.gmra.mrb[16].mxu0 %vm968_vm3, %v1371_v34 }
 0x45c   : > { %2235 = vmatprep.mubr.msk.bf16.mxu0 %vm2647_vm1, %v2646_v2  ;;  %2232 = vmatpush3.bf16.msra.mxu0 %v2393_v12 }
 0x45d   : > { %2233 = vmatprep.subr.bf16.mxu0 %v2646_v2 }
 0x460   : > { %2234 = vmatpush3.bf16.msra.mxu0 %v2394_v13 }
 0x4f9   : > { %v1078_v35 = vpop.f32.mrb[4].mxu0 }
 0x4fa   : > { %v2185_v36 = vpop.f32.mrb[5].mxu0 }
 0x4fb   : > { %v1081_v37 = vpop.f32.mrb[6].mxu0 }
 0x4fc   : > { %v2186_v38 = vpop.f32.mrb[7].mxu0 }
 0x501   : > { %v1190_v39 = vpop.f32.mrb[8].mxu0 }
 0x502   : > { %1421 = vrot.lane.b32.xlu1 %v1190_v39, %s2659_s23  ;;  %v2197_v40 = vpop.f32.mrb[9].mxu0 }
 0x503   : > { %v1193_v41 = vpop.f32.mrb[10].mxu0 }
 0x504   : > { %v2198_v42 = vpop.f32.mrb[11].mxu0  ;;  %v2114_v41 = vld [vmem:[%s879_s7] ss:$0 sm:$0xff] }
 0x526   : > { %v1302_v45 = vpop.f32.mrb[12].mxu0 }
 0x527   : > { %1425 = vrot.lane.b32.xlu0 %v1302_v45, %s2660_s11  ;;  %v2209_v46 = vpop.f32.mrb[13].mxu0  ;;  %s3406_s11 = sld [smem:[#allocation40_spill]] (!%p2122_p3) }
 0x528   : > { %v1305_v47 = vpop.f32.mrb[14].mxu0 }
 0x529   : > { %v2210_v48 = vpop.f32.mrb[15].mxu0 }
 0x52e   : > { %v1414_v49 = vpop.f32.mrb[16].mxu0 }
 0x52f   : > { %1429 = vrot.lane.b32.xlu1 %v1414_v49, %s2661_s21  ;;  %v2221_v50 = vpop.f32.mrb[17].mxu0 }
 0x530   : > { %v1417_v51 = vpop.f32.mrb[18].mxu0 }
 0x531   : > { %v2222_v52 = vpop.f32.mrb[19].mxu0 }
 0x574   : > { %v1422_v53 = vpop.permute.xlu1 %1421 }
 0x575   : > { %v1432_v55 = vsel %vm968_vm3, %v1078_v35, %v1422_v53 }
 0x599   : > { %v1426_v54 = vpop.permute.xlu0 %1425 }
 0x59a   : > { %v1434_v56 = vsel %vm1433_vm5, %v1432_v55, %v1426_v54 }
 0x5a1   : > { %v1430_v57 = vpop.permute.xlu1 %1429 }
 0x5a2   : > { %v1436_v58 = vsel %vm1435_vm6, %v1434_v56, %v1430_v57 }
 0x5a3   : > { %v1437_v59 = vpack.c.bf16 %v1436_v58, %v1436_v58  ;;  %v2120_v58 = vld [vmem:[%s882_s18] ss:$0 sm:$0xff] }
 0x5a5   : > { %2228 = vmatmul.mubr.msk.bf16.vlgmr.msra.gmra.mrb[16].mxu1 %vm919_vm2, %v1437_v59 }
 0x5a6   : > { %2247 = vmatprep.mubr.msk.bf16.mxu1 %vm2647_vm1, %v2646_v2  ;;  %2240 = vmatpush3.bf16.msra.mxu1 %v2395_v11 }
 0x5a7   : > { %2241 = vmatprep.subr.bf16.mxu1 %v2646_v2 }
 0x5aa   : > { %2242 = vmatpush3.bf16.msra.mxu1 %v2396_v23  ;;  %v1746_v23 = vld [vmem:[%s3406_s11] sm:$0x1] (!%p2122_p3) }
 0x5ab   : > { %2243 = vmatprep.subr.bf16.mxu1 %v2646_v2 }
 0x5ae   : > { %2244 = vmatpush3.bf16.msra.mxu1 %v2397_v24 }
 0x5af   : > { %2245 = vmatprep.subr.bf16.mxu1 %v2646_v2 }
 0x5b2   : > { %2246 = vmatpush3.bf16.msra.mxu1 %v2398_v25  ;;  %v1747_v25 = vld [vmem:[%s3407_s8] sm:$0x1] (!%p2122_p3) }
 0x678   : > { %v1498_v61 = vpop.f32.mrb[16].mxu1 }
 0x679   : > { %v1499_v62 = vadd.f32 %v2104_v60, %v1498_v61  ;;  %v2229_v63 = vpop.f32.mrb[17].mxu1  ;;  %v2121_v60 = vld [vmem:[%s885_s15] ss:$0 sm:$0xff] }
 0x67a   : > { %v1501_v0 = vpop.f32.mrb[18].mxu1  ;;  %v2123_v63 = vld [vmem:[%s3404_s5] ss:$0 sm:$0xff] (!%p2122_p3) }
 0x67b   : > { %v2230_v1 = vpop.f32.mrb[19].mxu1  ;;  %v1504_v3 = vadd.f32 %v1499_v62, %v3074_v4 }
 0x67d   : > { %v1507_v5 = vsel %vm919_vm2, %v1504_v3, 0.0 }
 0x67e   : > { %1508 = vadd.xlane.f32.xlu0 %v1507_v5 }
 0x70b   : > { %v1509_v6 = vpop.xlane.xlu0 %1508 }
 0x70c   : > { %v1511_v7 = vmul.f32 0.03125, %v1509_v6 }
 0x70e   : > { %v1512_v8 = vsub.f32 %v1504_v3, %v1511_v7 }
 0x710   : > { %v1513_v9 = vmul.f32 %v1512_v8, %v1512_v8 }
 0x712   : > { %v1514_v10 = vsel %vm919_vm2, %v1513_v9, 0.0 }
 0x713   : > { %1515 = vadd.xlane.f32.xlu1 %v1514_v10 }
 0x7a0   : > { %v1516_v4 = vpop.xlane.xlu1 %1515 }
 0x7a1   : > { %v1517_v14 = vmul.f32 0.03125, %v1516_v4 }
 0x7a3   : > { %v1518_v15 = vadd.f32 1e-05, %v1517_v14 }
 0x7a5   : > { %2415 = vrsqrt.f32 %v1518_v15 }
 0x7af   : > { %v2416_v16 = vpop.eup %2415 }
 0x7b0   : > { %v1520_v18 = vmul.f32 %v2416_v16, %v1512_v8 }
 0x7b2   : > { %v1527_v20 = vmul.f32 %v2108_v17, %v1520_v18  ;;  %v2421_v17 = vld [vmem:[%s3405_s26] sm:$0xff] (!%p2122_p3)   ;;  %v2662_v18 = vmov (!%p2122_p3), 0.0  }
 0x7b3   : > { %2251 = vmatprep.subr.bf16.mxu0 (!%p2122_p3), %v2662_v18 }
 0x7b4   : > { %v1534_v21 = vadd.f32 %v2109_v19, %v1527_v20  ;;  %v2422_v19 = vld [vmem:[%s3405_s26 + $0x8] sm:$0xff] (!%p2122_p3)  }
 0x7b6   : > { %v1535_v22 = vpack.c.bf16 %v1534_v21, %v1534_v21 }
 0x7b8   : > { %2236 = vmatmul.mubr.msk.bf16.vlgmr.msra.gmra.mrb[20].mxu0 %vm919_vm2, %v1535_v22 }
 0x7b9   : > { %2255 = vmatprep.mubr.msk.bf16.mxu0 (!%p2122_p3), %vm2663_vm8, %v2662_v18  ;;  %2252 = vmatpush3.bf16.msra.mxu0 (!%p2122_p3), %v2421_v17 }
 0x7ba   : > { %2253 = vmatprep.subr.bf16.mxu0 (!%p2122_p3), %v2662_v18 }
 0x7bd   : > { %2254 = vmatpush3.bf16.msra.mxu0 (!%p2122_p3), %v2422_v19 }
 0x88b   : > { %v1596_v27 = vpop.f32.mrb[20].mxu0 }
 0x88c   : > { %v1597_v28 = vadd.f32 %v2110_v26, %v1596_v27  ;;  %v2237_v29 = vpop.f32.mrb[21].mxu0 }
 0x88d   : > { %v1599_v30 = vpop.f32.mrb[22].mxu0  ;;  %v1768_v29 = vld [vmem:[%s3408_s20] sm:$0x1] (!%p2122_p3) }
 0x88e   : > { %v1602_v31 = vmul.f32 %v1597_v28, %v1597_v28  ;;  %v2238_v32 = vpop.f32.mrb[23].mxu0 }
 0x890   : > { %v1603_v33 = vmul.f32 %v1602_v31, %v1597_v28 }
 0x892   : > { %v1604_v34 = vmul.f32 0.044715, %v1603_v33 }
 0x894   : > { %v1605_v35 = vadd.f32 %v1604_v34, %v1597_v28 }
 0x896   : > { %v1606_v36 = vmul.f32 0.7978846, %v1605_v35 }
 0x898   : > { %2417 = vtanh.f32 %v1606_v36 }
 0x8a2   : > { %v2418_v37 = vpop.eup %2417 }
 0x8a3   : > { %v1608_v38 = vadd.f32 1.0, %v2418_v37 }
 0x8a5   : > { %v1609_v39 = vmul.f32 0.5, %v1608_v38 }
 0x8a7   : > { %v1610_v2 = vmul.f32 %v1609_v39, %v1597_v28 }
 0x8a9   : > { %v1611_v40 = vpack.c.bf16 %v1610_v2, %v1610_v2 }
 0x8ab   : > { %2248 = vmatmul.mubr.msk.bf16.vlgmr.msra.gmra.mrb[20].mxu1 %vm1651_vm7, %v1611_v40 }
 0x97e   : > { %v1689_v42 = vpop.f32.mrb[20].mxu1 }
 0x97f   : > { %v1690_v43 = vadd.f32 %v2114_v41, %v1689_v42  ;;  %v2249_v44 = vpop.f32.mrb[21].mxu1 }
 0x980   : > { %v1692_v45 = vpop.f32.mrb[22].mxu1 }
 0x981   : > { %v2250_v46 = vpop.f32.mrb[23].mxu1  ;;  %v1695_v47 = vadd.f32 %v1690_v43, %v1534_v21 }
 0x983   : > { %v1698_v48 = vsel %vm919_vm2, %v1695_v47, 0.0 }
 0x984   : > { %1699 = vadd.xlane.f32.xlu0 %v1698_v48 }
 0xa11   : > { %v1700_v49 = vpop.xlane.xlu0 %1699 }
 0xa12   : > { %v1701_v50 = vmul.f32 0.03125, %v1700_v49 }
 0xa14   : > { %v1702_v51 = vsub.f32 %v1695_v47, %v1701_v50 }
 0xa16   : > { %v1703_v52 = vmul.f32 %v1702_v51, %v1702_v51 }
 0xa18   : > { %v1704_v53 = vsel %vm919_vm2, %v1703_v52, 0.0 }
 0xa19   : > { %1705 = vadd.xlane.f32.xlu0 %v1704_v53 }
 0xa2f   : > { %1736 = vbcast.lane.b32.xlu0 (!%p2122_p3), %v2123_v63, 256 }
 0xaa6   : > { %v1706_v54 = vpop.xlane.xlu0 %1705 }
 0xaa7   : > { %v1707_v55 = vmul.f32 0.03125, %v1706_v54 }
 0xaa9   : > { %v1708_v56 = vadd.f32 1e-05, %v1707_v55 }
 0xaaa   : > { %v1737_v0 = vpop.permute.xlu0 (!%p2122_p3), %1736 }
 0xaab   : > { %2419 = vrsqrt.f32 %v1708_v56 }
 0xab5   : > { %v2420_v57 = vpop.eup %2419 }
 0xab6   : > { %v1710_v59 = vmul.f32 %v2420_v57, %v1702_v51  ;;  %1729 = sbr.rel (%p2122_p3) target bundleno = 3293 (0xcdd), region = 116 }
 0xab8   : > { %v1717_v61 = vmul.f32 %v2120_v58, %v1710_v59 }
 0xaba   : > { %v1724_v62 = vadd.f32 %v2121_v60, %v1717_v61 }
 0xabc   : > { %1725 = vst.msk [vmem:[#allocation2] sm:$0xff] %vm919_vm2, %v1724_v62  ;;  %v1738_v1 = vmul.f32 (!%p2122_p3), %v1737_v0, %v1724_v62 }
 0xabe   : > { %v1739_v3 = vsel %vm919_vm2, %v1738_v1, 0.0 }
 0xabf   : > { %v1740_v5 = vrot.slane %v1739_v3, 4 }
 0xac1   : > { %v1741_v6 = vadd.f32 %v1740_v5, %v1739_v3 }
 0xac3   : > { %v1742_v7 = vrot.slane %v1741_v6, 2 }
 0xac5   : > { %v1743_v8 = vadd.f32 %v1742_v7, %v1741_v6 }
 0xac7   : > { %v1744_v9 = vrot.slane %v1743_v8, 1 }
 0xac9   : > { %v1745_v10 = vadd.f32 %v1744_v9, %v1743_v8 }
 0xacb   : > { %v1748_v12 = vsel %vm919_vm2, %v1745_v10, 0.0 }
 0xacc   : > { %1749 = vadd.xlane.f32.xlu0 %v1748_v12 }
 0xb59   : > { %v1750_v13 = vpop.xlane.xlu0 %1749 }
 0xb5a   : > { %v1751_v4 = vmul.f32 0.03125, %v1750_v13 }
 0xb5c   : > { %v1752_v14 = vsub.f32 %v1745_v10, %v1751_v4 }
 0xb5e   : > { %v1753_v15 = vmul.f32 %v1752_v14, %v1752_v14 }
 0xb60   : > { %v1754_v16 = vsel %vm919_vm2, %v1753_v15, 0.0 }
 0xb61   : > { %1755 = vadd.xlane.f32.xlu1 %v1754_v16 }
 0xbee   : > { %v1756_v20 = vpop.xlane.xlu1 %1755 }
 0xbef   : > { %v1757_v21 = vmul.f32 0.03125, %v1756_v20 }
 0xbf1   : > { %v1758_v22 = vadd.f32 1e-05, %v1757_v21 }
 0xbf3   : > { %2423 = vrsqrt.f32 %v1758_v22 }
 0xbfd   : > { %v2424_v11 = vpop.eup %2423 }
 0xbfe   : > { %v1760_v24 = vmul.f32 %v2424_v11, %v1752_v14 }
 0xc00   : > { %v1761_v26 = vmul.f32 %v1760_v24, %v1746_v23 }
 0xc02   : > { %v1762_v27 = vadd.f32 %v1761_v26, %v1747_v25 }
 0xc04   : > { %v1763_v28 = vpack.c.bf16 %v1762_v27, %v1762_v27 }
 0xc06   : > { %2256 = vmatmul.mubr.msk.bf16.vlgmr.msra.gmra.mrb[0].mxu0 %vm919_vm2, %v1763_v28 }
 0xcd9   : > { %v1818_v30 = vpop.f32.mrb[0].mxu0 }
 0xcda   : > { %v1819_v31 = vadd.f32 %v1818_v30, %v1768_v29  ;;  %v2257_v32 = vpop.f32.mrb[1].mxu0 }
 0xcdb   : > { %v1821_v33 = vpop.f32.mrb[2].mxu0 }
 0xcdc   : > { %1825 = vst.msk [vmem:[%s3067_s9] sm:$0x1] %vm1824_vm9, %v1819_v31  ;;  %v2258_v34 = vpop.f32.mrb[3].mxu0 }
 0xcdd PF: > { %s3409_s29 = sld [smem:[#allocation17_spill]]  ;;  %s3410_s25 = sld [smem:[#allocation25_spill]] }
 0xcde   : > { %s3411_s27 = sld [smem:[#allocation44_spill]]  ;;  %s1839_s10 = sshll.u32 %s3067_s9, 4  ;;  %s1840_s10 = int_to_ptr.vmem [resolvable:$true] %s1839_s10 }
 0xcdf   : > { %s3412_s0 = sand.u32 1, %s2605_s30   ;;  %s2515_s28 = scalar_lea.vmem %s1840_s10, 16 }
 0xce0   : > { %s1827_s3 = scalar_lea.sflag [#allocation5], %s3412_s0  ;;  %p2516_p8 = scmp.ne.s32.totalorder %s1840_s10, %s2515_s28 }
 0xce1   : > { %s2664_s19 = smov [#allocation9]  }
 0xce2   : > { %s2519_s5 = sshll.u32 %s2664_s19, 4  ;;  %s2520_s5 = int_to_ptr.vmem [resolvable:$false] %s2519_s5 }
 0xce3   : > { %s2127_s13 = sshll.u32 %s3409_s29, 4  ;;  %p3413_p12 = scmp.ne.s32.totalorder %s3410_s25, 0 }
 0xce4   : > { %s3238_s16 = scalar_lea.hbm %s3411_s27, %s2127_s13  ;;  %s2521_s2 = scalar_lea.vmem %s2520_s5, 32 }
 0xce5   : > { %p2517_p0 = pnand %p2516_p8, %p3413_p12  ;;  %p2522_p2 = scmp.lt.s32.totalorder %s1840_s10, %s2520_s5 }
 0xce6   : > { %p2523_p10 = scmp.lt.s32.totalorder %s2521_s2, %s2515_s28 }
 0xce7   : > { %p2518_p1 = pneg %p2517_p0 }
 0xce8   : > { %p2524_p9 = por %p2523_p10, %p2522_p2 }
 0xcea   : > { %p2525_p11 = pnand %p2524_p9, %p2518_p1 }
 0xcec   : > { %2528 = shalt.err (!%p2525_p11)
}
 0xced   : > { %s2529_s9 = scalar_lea.hbm %s3238_s16, 16  ;;  %s2533_s15 = scalar_lea.hbm %s3411_s27, 32 }
 0xcee   : > { %p2530_p6 = scmp.ne.s32.totalorder %s3238_s16, %s2529_s9  ;;  %p2534_p13 = scmp.lt.u32.totalorder %s3238_s16, %s3411_s27 }
 0xcef   : > { %p2535_p5 = scmp.lt.u32.totalorder %s2533_s15, %s2529_s9  ;;  %p2537_p8 = scmp.lt.u32.totalorder %s2529_s9, %s3238_s16 }
 0xcf0   : > { %p2531_p7 = pnand %p2530_p6, %p3413_p12 }
 0xcf1   : > { %p2536_p3 = por %p2535_p5, %p2534_p13 }
 0xcf2   : > { %p2532_p4 = pneg %p2531_p7 }
 0xcf3   : > { %p2538_p0 = por %p2537_p8, %p2536_p3 }
 0xcf5   : > { %p2539_p1 = pnand %p2538_p0, %p2532_p4 }
 0xcf7   : > { %2542 = shalt.err (!%p2539_p1)
}
 0xcf8   : > { %2265 = dma.vmem_to_hbm [thread:$0]  (%p3413_p12), %s1840_s10, 16, %s3238_s16, %s1827_s3  }
 0xcf9 PF: > { %s3414_s11 = sld [smem:[#allocation20_spill]]  ;;  %s3415_s21 = sld [smem:[#allocation13_spill]] }
 0xcfa   : > { %s3416_s24 = sld [smem:[#allocation26_spill]] }
 0xcff   : > { %p2282_p2 = scmp.ge.s32.totalorder %s3414_s11, 2  ;;  %s1851_s8 = sand.u32 1, %s3415_s21  }
 0xd00   : > { %p3417_p10 = scmp.ne.s32.totalorder %s3416_s24, 0  ;;  %s1852_s22 = scalar_lea.sflag [#allocation5], %s1851_s8 }
 0xd02   : > { %p2278_p9 = pnand %p2282_p2, %p3417_p10 }
 0xd04   : > { %2596 = dma.done.wait (!%p2278_p9), %s1852_s22, 16  }
 0xd05   : > { %2598 = vsyncadd (!%p2278_p9), %s1852_s22, 4294967280  ;;  %s38_s3 = sadd.s32 1, %s3414_s11   ;;  %s3418_s17 = sld [smem:[#allocation14_spill]] }
 0xd06   : > { %p35_p11 = scmp.ge.s32.totalorder %s38_s3, 6   ;;  %s3419_s20 = sld [smem:[#allocation24_spill]] }
 0xd07   : > { %s3420_s21 = sld [smem:[#allocation15_spill]]  ;;  %s3421_s1 = sld [smem:[#allocation16_spill]] }
 0xd08   : > { %s3422_s22 = sld [smem:[#allocation23_spill]]  ;;  %s3423_s2 = sld [smem:[#allocation18_spill]] }
 0xd09   : > { %s3424_s23 = sld [smem:[#allocation19_spill]]  ;;  %s3425_s24 = sld [smem:[#allocation21_spill]] }
 0xd0a   : > { %s3426_s25 = sld [smem:[#allocation22_spill]]  ;;  %s3427_s0 = smov %s2605_s30 }
 0xd0b   : > { %s3428_s30 = smov %s3418_s17  ;;  %37 = sbr.rel (!%p35_p11) target bundleno = 30 (0x1e), region = 209 }
 0xd12   :  { %1856 = vsyncpa [#allocation4], 1 }
 0xd13   :  { %1858 = vsyncpa [#allocation4 + $0x1], 1 }
 0xd14   :  { %1859 = vsyncpa [#allocation7], 1 }
 0xd15   :  { %1861 = vsyncpa [#allocation7 + $0x1], 1 }
 0xd16   :  { %1862 = vsyncpa [#allocation5], 1 }
 0xd17   :  { %1864 = vsyncpa [#allocation5 + $0x1], 1 }

</bundles_post_ra>
